<compile_context>
chip_gen: v7x
topology: tpu7x:2x2x1
jax: 0.10.0
libtpu: 0.0.40
codegen_flags: <defaults>
</compile_context>

<pallas_src>
import functools

import numpy as np
import jax
import jax.numpy as jnp
from jax.experimental import pallas as pl
from jax.experimental.pallas import tpu as pltpu

# ----- module hyper-parameters (from the PyTorch script) -----
IN_CHANNELS = 1
OUT_CHANNELS = 10
HIDDEN_CHANNELS = 32
OMEGA_0 = 30.0
USE_BIAS = True

MAX_TIME_TILE = 256      # time / lag tile (multiple of 128); 256 keeps builds vreg-friendly
LAG_SLAB = 128           # lag rows per strided-roll + MXU contraction slab
LANE = 128

CONV_COMPUTE_DTYPE = jnp.float32   # set jnp.bfloat16 on v6e/v7x after re-validating tol


def _ceil_to(v, m):
    return ((v + m - 1) // m) * m


def _choose_tiles(L):
    """Return (tile, padded_length) with tile a multiple of 128 dividing padded_length."""
    lp = _ceil_to(max(L, 1), LANE)
    if lp <= MAX_TIME_TILE:
        return lp, lp
    return MAX_TIME_TILE, _ceil_to(L, MAX_TIME_TILE)


# ---------------------------------------------------------------------------
# Kernel 1: KernelNet — SIREN MLP evaluated at the L relative positions.
#   grid = (Lp // tile,)  over lane-dense time tiles of the generated kernel.
#   inputs : w1 (H,1) b1 (H,1) w2 (H,H) b2 (H,1) w3p (Cp,H) b3p (Cp,1)
#            (weight_norm folded in glue; last layer zero-padded to Cp=16 rows)
#   outputs: krev (Cp, Lp)  column j = K[:, L-1-j]   (consumed directly by the conv)
#            kfwd (Cp, Lp)  column c = K[:, c]       (returned conv_kernel buffer)
#   Columns >= L and pad rows >= Cout are exactly zero.
# ---------------------------------------------------------------------------
def kernelnet_kernel(w1_ref, b1_ref, w2_ref, b2_ref, w3_ref, b3_ref,
                     krev_ref, kfwd_ref, *, true_len):
    tile = krev_ref.shape[-1]
    jt = pl.program_id(0)
    col = jax.lax.broadcasted_iota(jnp.int32, (1, tile), 1) + jt * tile   # global position
    valid = col < true_len
    inv = 2.0 / max(true_len - 1, 1)                                      # L == 1 guard
    colf = col.astype(jnp.float32)

    def siren(rel):
        # layer 1 is a 1x1 conv with a single input channel -> outer product.
        h = jnp.sin(OMEGA_0 * (w1_ref[...] * rel + b1_ref[...]))          # (H, tile)
        h = jnp.sin(OMEGA_0 * (jnp.dot(w2_ref[...], h,
                                       preferred_element_type=jnp.float32)
                               + b2_ref[...]))                            # (H, tile)
        return (jnp.dot(w3_ref[...], h, preferred_element_type=jnp.float32)
                + b3_ref[...])                                            # (Cp, tile)

    # forward layout (for the exposed conv_kernel buffer): rel = -1 + 2*c/(L-1)
    kfwd_ref[...] = jnp.where(valid, siren(-1.0 + inv * colf), 0.0)
    # lag-reversed layout (consumed by the conv): column j evaluated at position L-1-j
    krev_ref[...] = jnp.where(valid, siren(1.0 - inv * colf), 0.0)


def run_kernelnet(w1, b1, w2, b2, w3p, b3p, L, Lp, tile):
    Cp, H = w3p.shape
    args = (w1, b1, w2, b2, w3p, b3p)
    const = lambda j: (0, 0)
    flops = 2 * Lp * 2 * (H + H * H + Cp * H)
    trans = 2 * Lp * 2 * H
    bytes_accessed = 4 * (3 * H + H * H + Cp * H + Cp + 2 * Cp * Lp)
    return pl.pallas_call(
        functools.partial(kernelnet_kernel, true_len=L),
        out_shape=(jax.ShapeDtypeStruct((Cp, Lp), jnp.float32),
                   jax.ShapeDtypeStruct((Cp, Lp), jnp.float32)),
        grid=(Lp // tile,),
        in_specs=[pl.BlockSpec(a.shape, const) for a in args],
        out_specs=[pl.BlockSpec((Cp, tile), lambda j: (0, j)),
                   pl.BlockSpec((Cp, tile), lambda j: (0, j))],
        compiler_params=pltpu.CompilerParams(dimension_semantics=("parallel",)),
        cost_estimate=pl.CostEstimate(flops=int(flops), transcendentals=int(trans),
                                      bytes_accessed=int(bytes_accessed)),
    )(*args)


# ---------------------------------------------------------------------------
# Kernel 2: causal convolution as a tiled Toeplitz/Hankel matmul on the MXU.
#
#   y[b,o,t] = bias[o] + sum_{j=0..t} Krev[o,j] * x[b,0,t-j],   Krev[o,j] = K[o,0,L-1-j]
#
#   grid = (B, n_pairs) where n_pairs enumerates only the causal lower-triangular
#   (jt, jj) block pairs, jt-major, via two scalar-prefetched int32 tables.  For a
#   pair with d = jt - jj the needed x samples live in time blocks d-1 and d; the
#   Hankel slab H[r, t'] = window[T + t' - (q*128 + r)] is built with ONE strided
#   XLU rotate per 128-row slab and contracted (Cp,128)@(128,T) on the MXU into the
#   resident f32 output block.  Only the diagonal block (d==0) masks (the 1xT
#   previous-block row); all other blocks need no mask.
#
#   TODO(synk): for very long L, amortize the Hankel per diagonal d (O(nT) builds)
#   using input_output_aliases read-modify-write of y; skipped here for simplicity.
#   TODO(synk): Cin > 1 would stack per-channel Hankels along K; module fixes Cin=1.
# ---------------------------------------------------------------------------
def causal_conv_kernel(jt_ref, jj_ref, krev_ref, xc_ref, xp_ref, bias_ref, y_ref):
    # jt_ref/jj_ref : (n_pairs,) int32 in SMEM (scalar prefetch)
    # krev_ref      : (Cp, T)    lag block jj of the reversed kernel (zero past L)
    # xc_ref        : (1, 1, T)  x time block d = jt - jj
    # xp_ref        : (1, 1, T)  x time block d-1 (clamped; zeroed in-kernel when d==0)
    # bias_ref      : (Cp, 1)
    # y_ref         : (1, Cp, T) output time block jt; resident f32 accumulator over jj
    s = pl.program_id(1)
    jt = jt_ref[s]
    jj = jj_ref[s]
    d = jt - jj
    Cp, T = y_ref.shape[1], y_ref.shape[2]

    @pl.when(jj == 0)
    def _init():                                   # init accumulator with bias
        y_ref[...] = jnp.broadcast_to(bias_ref[...][None], y_ref.shape)

    xc_row = xc_ref[0]                             # (1, T)
    # causal mask collapses to zeroing the previous-block row on the diagonal only.
    xp_row = jnp.where(d == 0, 0.0, xp_ref[0])     # (1, T)
    window = jnp.concatenate([xp_row, xc_row], axis=-1)          # (1, 2T)
    g0 = jnp.broadcast_to(window, (LAG_SLAB, 2 * T))             # hoisted out of slab loop

    acc = jnp.zeros((Cp, T), jnp.float32)
    for q in range(T // LAG_SLAB):                 # static; at most T/128 slabs
        # slab row r needs window index T + t' - (q*128 + r): one strided XLU rotate.
        g = pltpu.roll(g0, q * LAG_SLAB, axis=1, stride=1, stride_axis=0)
        hank = g[:, T:]                                          # (128, T), aligned slice
        kr = krev_ref[:, q * LAG_SLAB:(q + 1) * LAG_SLAB]        # (Cp, 128)
        acc = acc + jnp.dot(kr.astype(CONV_COMPUTE_DTYPE),
                            hank.astype(CONV_COMPUTE_DTYPE),
                            preferred_element_type=jnp.float32)

    y_ref[...] += acc[None]


def run_causal_conv(krev, xpad, bias, tile, true_len):
    Cp, Lp = krev.shape
    B, Cin, _ = xpad.shape
    nT = Lp // tile

    # triangular (jt, jj) enumeration, jt-major so the y block stays resident.
    jt_list, jj_list = [], []
    for t in range(nT):
        for k in range(t + 1):
            jt_list.append(t)
            jj_list.append(k)
    jt_of = jnp.asarray(jt_list, dtype=jnp.int32)
    jj_of = jnp.asarray(jj_list, dtype=jnp.int32)
    n_pairs = len(jt_list)

    flops = B * OUT_CHANNELS * Cin * true_len * (true_len + 1)   # 2 * causal MACs
    bytes_accessed = 4 * (B * n_pairs * (Cp * tile + 2 * Cin * tile)
                          + B * Cp * Lp + Cp)
    return pl.pallas_call(
        causal_conv_kernel,
        out_shape=jax.ShapeDtypeStruct((B, Cp, Lp), jnp.float32),
        grid_spec=pltpu.PrefetchScalarGridSpec(
            num_scalar_prefetch=2,
            grid=(B, n_pairs),
            in_specs=[
                pl.BlockSpec((Cp, tile),
                             lambda b, s, jt, jj: (0, jj[s])),
                pl.BlockSpec((1, Cin, tile),
                             lambda b, s, jt, jj: (b, 0, jt[s] - jj[s])),
                pl.BlockSpec((1, Cin, tile),
                             lambda b, s, jt, jj:
                             (b, 0, jnp.maximum(jt[s] - jj[s] - 1, 0))),
                pl.BlockSpec((Cp, 1), lambda b, s, jt, jj: (0, 0)),
            ],
            out_specs=pl.BlockSpec((1, Cp, tile),
                                   lambda b, s, jt, jj: (b, 0, jt[s])),
        ),
        compiler_params=pltpu.CompilerParams(
            dimension_semantics=("parallel", "arbitrary")),
        cost_estimate=pl.CostEstimate(flops=int(flops), transcendentals=0,
                                      bytes_accessed=int(bytes_accessed)),
    )(jt_of, jj_of, krev, xpad, xpad, bias)


# ---------------------------------------------------------------------------
# CKConv forward: glue (weight-norm / tiny pads) + the two kernels.
# ---------------------------------------------------------------------------
def ckconv_forward(x, params):
    B, Cin, L = x.shape
    assert Cin == IN_CHANNELS == 1   # TODO(synk): Cin > 1 needs channel-stacked Hankels
    Cout = OUT_CHANNELS
    tile, Lp = _choose_tiles(L)
    Cp = _ceil_to(Cout, 8)           # dense sublane count (16)

    # pad the last SIREN layer to Cp rows once (tiny): kernel 1 then emits the
    # reversed kernel in its final (Cp, Lp) layout -- no flip/transpose relayout.
    w3p = jnp.pad(params["w3"], ((0, Cp - Cout), (0, 0)))
    b3p = jnp.pad(params["b3"], ((0, Cp - Cout), (0, 0)))

    krev, kfwd = run_kernelnet(params["w1"], params["b1"], params["w2"],
                               params["b2"], w3p, b3p, L, Lp, tile)
    conv_kernel = kfwd[:Cout, :L].reshape(Cout, Cin, L)   # torch .view(-1, Cin, L)

    # only lane-alignment padding of x (no 2L-1 causal zero-pad).
    xpad = jnp.pad(x, ((0, 0), (0, 0), (0, Lp - L)))
    biasp = jnp.pad(params["conv_bias"], (0, Cp - Cout)).reshape(Cp, 1)

    y = run_causal_conv(krev, xpad, biasp, tile, L)        # (B, Cp, Lp)
    return y[:, :Cout, :L], conv_kernel


# ---------------------------------------------------------------------------
# Deterministic synthetic parameter init (shapes per KernelNet.__init__).
# weight_norm(dim=0): w = g * v / ||v||  computed here (glue).
# TODO(synk): torch RNG (uniform_) ordering is not reproduced bit-exactly; this
#             is a synthetic deterministic init at the documented scales.
# ---------------------------------------------------------------------------
def init_params(key):
    H, C = HIDDEN_CHANNELS, OUT_CHANNELS * IN_CHANNELS
    ks = jax.random.split(key, 9)
    lim = float(np.sqrt(6.0 / H) / OMEGA_0)

    def wn(v, g):
        n = jnp.sqrt(jnp.sum(v * v, axis=1, keepdims=True))
        return (g * v / n).astype(jnp.float32)

    v1 = jax.random.uniform(ks[0], (H, 1), minval=-1.0, maxval=1.0)
    g1 = jax.random.uniform(ks[1], (H, 1), minval=0.5, maxval=1.5)
    b1 = jax.random.uniform(ks[2], (H, 1), minval=-1.0, maxval=1.0)
    v2 = jax.random.uniform(ks[3], (H, H), minval=-lim, maxval=lim)
    g2 = jax.random.uniform(ks[4], (H, 1), minval=0.5, maxval=1.5)
    b2 = jax.random.uniform(ks[5], (H, 1), minval=-1.0, maxval=1.0)
    v3 = jax.random.uniform(ks[6], (C, H), minval=-lim, maxval=lim)
    g3 = jax.random.uniform(ks[7], (C, 1), minval=0.5, maxval=1.5)
    b3 = jax.random.uniform(ks[8], (C, 1), minval=-1.0, maxval=1.0)
    return {
        "w1": wn(v1, g1), "b1": b1.astype(jnp.float32),
        "w2": wn(v2, g2), "b2": b2.astype(jnp.float32),
        "w3": wn(v3, g3), "b3": b3.astype(jnp.float32),
        # CKConv.__init__: self.bias.data.fill_(0.0)
        "conv_bias": jnp.zeros((OUT_CHANNELS,), jnp.float32),
    }


# ---------------------------------------------------------------------------
# Pure numpy reference (same semantics) for a correctness check.
# ---------------------------------------------------------------------------
def reference_forward(x, params):
    x = np.asarray(x, np.float64)
    w1 = np.asarray(params["w1"], np.float64); b1 = np.asarray(params["b1"], np.float64)
    w2 = np.asarray(params["w2"], np.float64); b2 = np.asarray(params["b2"], np.float64)
    w3 = np.asarray(params["w3"], np.float64); b3 = np.asarray(params["b3"], np.float64)
    cbias = np.asarray(params["conv_bias"], np.float64)
    B, _, L = x.shape
    rel = np.linspace(-1.0, 1.0, L).reshape(1, L)
    h = np.sin(OMEGA_0 * (w1 @ rel + b1))
    h = np.sin(OMEGA_0 * (w2 @ h + b2))
    kflat = w3 @ h + b3
    kern = kflat.reshape(OUT_CHANNELS, IN_CHANNELS, L)
    y = np.zeros((B, OUT_CHANNELS, L))
    for t in range(L):
        for j in range(t + 1):
            y[:, :, t] += np.einsum("oi,bi->bo", kern[:, :, L - 1 - j], x[:, :, t - j])
    y += cbias.reshape(1, -1, 1)
    return y, kern


if __name__ == "__main__":
    key = jax.random.PRNGKey(0)
    kx, kp = jax.random.split(key)
    B, L = 2, 16
    x = jax.random.normal(kx, (B, IN_CHANNELS, L), dtype=jnp.float32)
    params = init_params(kp)

    y, conv_kernel = ckconv_forward(x, params)
    y = jax.block_until_ready(y)
    conv_kernel = jax.block_until_ready(conv_kernel)

    y_ref, k_ref = reference_forward(np.asarray(x), params)
    np.testing.assert_allclose(np.asarray(conv_kernel), k_ref, rtol=2e-3, atol=2e-3)
    np.testing.assert_allclose(np.asarray(y), y_ref, rtol=2e-2, atol=2e-2)
    print("KERNEL_OK")
</pallas_src>

<mosaic_0001>
module attributes {stable_mosaic.version = 11 : i64} {
  func.func @kernelnet_kernel(%arg0: i32, %arg1: memref<32x1xf32, #tpu.memory_space<vmem>>, %arg2: memref<32x1xf32, #tpu.memory_space<vmem>>, %arg3: memref<32x32xf32, #tpu.memory_space<vmem>>, %arg4: memref<32x1xf32, #tpu.memory_space<vmem>>, %arg5: memref<16x32xf32, #tpu.memory_space<vmem>>, %arg6: memref<16x1xf32, #tpu.memory_space<vmem>>, %arg7: memref<16x128xf32, #tpu.memory_space<vmem>>, %arg8: memref<16x128xf32, #tpu.memory_space<vmem>>) attributes {dimension_semantics = [#tpu.dimension_semantics<parallel>], iteration_bounds = array<i64: 1>, scalar_prefetch = 0 : i64, scratch_operands = 0 : i64, tpu.core_type = #tpu.core_type<tc>, window_params = [{pipeline_mode = #tpu.pipeline_mode<synchronous>, transform_indices = @transform_0, window_bounds = array<i64: 32, 1>}, {pipeline_mode = #tpu.pipeline_mode<synchronous>, transform_indices = @transform_1, window_bounds = array<i64: 32, 1>}, {pipeline_mode = #tpu.pipeline_mode<synchronous>, transform_indices = @transform_2, window_bounds = array<i64: 32, 32>}, {pipeline_mode = #tpu.pipeline_mode<synchronous>, transform_indices = @transform_3, window_bounds = array<i64: 32, 1>}, {pipeline_mode = #tpu.pipeline_mode<synchronous>, transform_indices = @transform_4, window_bounds = array<i64: 16, 32>}, {pipeline_mode = #tpu.pipeline_mode<synchronous>, transform_indices = @transform_5, window_bounds = array<i64: 16, 1>}, {transform_indices = @transform_6, window_bounds = array<i64: 16, 128>}, {transform_indices = @transform_7, window_bounds = array<i64: 16, 128>}]} {
    %0 = tpu.iota {dimensions = array<i32: 1>} : vector<1x128xi32>
    %c128_i32 = arith.constant 128 : i32
    %1 = arith.muli %arg0, %c128_i32 : i32
    %2 = vector.broadcast %1 : i32 to vector<1x128xi32>
    %3 = arith.addi %0, %2 : vector<1x128xi32>
    %c16_i32 = arith.constant 16 : i32
    %4 = vector.broadcast %c16_i32 : i32 to vector<1x128xi32>
    %5 = arith.cmpi slt, %3, %4 : vector<1x128xi32>
    %6 = arith.sitofp %3 : vector<1x128xi32> to vector<1x128xf32>
    %cst = arith.constant 0.13333334 : f32
    %7 = vector.broadcast %cst : f32 to vector<1x128xf32>
    %8 = arith.mulf %7, %6 : vector<1x128xf32>
    %cst_0 = arith.constant -1.000000e+00 : f32
    %9 = vector.broadcast %cst_0 : f32 to vector<1x128xf32>
    %10 = arith.addf %9, %8 : vector<1x128xf32>
    %c0 = arith.constant 0 : index
    %c0_1 = arith.constant 0 : index
    %11 = vector.load %arg1[%c0, %c0_1] : memref<32x1xf32, #tpu.memory_space<vmem>>, vector<32x1xf32>
    %12 = vector.broadcast %11 : vector<32x1xf32> to vector<32x128xf32>
    %13 = vector.broadcast %10 : vector<1x128xf32> to vector<32x128xf32>
    %14 = arith.mulf %12, %13 : vector<32x128xf32>
    %c0_2 = arith.constant 0 : index
    %c0_3 = arith.constant 0 : index
    %15 = vector.load %arg2[%c0_2, %c0_3] : memref<32x1xf32, #tpu.memory_space<vmem>>, vector<32x1xf32>
    %16 = vector.broadcast %15 : vector<32x1xf32> to vector<32x128xf32>
    %17 = arith.addf %14, %16 : vector<32x128xf32>
    %cst_4 = arith.constant 3.000000e+01 : f32
    %18 = vector.broadcast %cst_4 : f32 to vector<32x128xf32>
    %19 = arith.mulf %18, %17 : vector<32x128xf32>
    %20 = math.sin %19 : vector<32x128xf32>
    %c0_5 = arith.constant 0 : index
    %c0_6 = arith.constant 0 : index
    %21 = vector.load %arg3[%c0_5, %c0_6] : memref<32x32xf32, #tpu.memory_space<vmem>>, vector<32x32xf32>
    %cst_7 = arith.constant dense<0.000000e+00> : vector<32x128xf32>
    %22 = tpu.matmul %21, %20, %cst_7 {dimension_numbers = #tpu.dot_dimension_numbers<[1], [0], [0], [1], [0, 0, 1, 1], [], []>} : vector<32x32xf32>, vector<32x128xf32>, vector<32x128xf32> -> vector<32x128xf32>
    %c0_8 = arith.constant 0 : index
    %c0_9 = arith.constant 0 : index
    %23 = vector.load %arg4[%c0_8, %c0_9] : memref<32x1xf32, #tpu.memory_space<vmem>>, vector<32x1xf32>
    %24 = vector.broadcast %23 : vector<32x1xf32> to vector<32x128xf32>
    %25 = arith.addf %22, %24 : vector<32x128xf32>
    %cst_10 = arith.constant 3.000000e+01 : f32
    %26 = vector.broadcast %cst_10 : f32 to vector<32x128xf32>
    %27 = arith.mulf %26, %25 : vector<32x128xf32>
    %28 = math.sin %27 : vector<32x128xf32>
    %c0_11 = arith.constant 0 : index
    %c0_12 = arith.constant 0 : index
    %29 = vector.load %arg5[%c0_11, %c0_12] : memref<16x32xf32, #tpu.memory_space<vmem>>, vector<16x32xf32>
    %cst_13 = arith.constant dense<0.000000e+00> : vector<16x128xf32>
    %30 = tpu.matmul %29, %28, %cst_13 {dimension_numbers = #tpu.dot_dimension_numbers<[1], [0], [0], [1], [0, 0, 1, 1], [], []>} : vector<16x32xf32>, vector<32x128xf32>, vector<16x128xf32> -> vector<16x128xf32>
    %c0_14 = arith.constant 0 : index
    %c0_15 = arith.constant 0 : index
    %31 = vector.load %arg6[%c0_14, %c0_15] : memref<16x1xf32, #tpu.memory_space<vmem>>, vector<16x1xf32>
    %32 = vector.broadcast %31 : vector<16x1xf32> to vector<16x128xf32>
    %33 = arith.addf %30, %32 : vector<16x128xf32>
    %cst_16 = arith.constant 0.000000e+00 : f32
    %34 = vector.shape_cast %5 : vector<1x128xi1> to vector<1x128xi1>
    %35 = vector.broadcast %34 : vector<1x128xi1> to vector<16x128xi1>
    %36 = vector.broadcast %cst_16 : f32 to vector<16x128xf32>
    %37 = arith.select %35, %33, %36 : vector<16x128xi1>, vector<16x128xf32>
    %c0_17 = arith.constant 0 : index
    %c0_18 = arith.constant 0 : index
    %38 = vector.load %arg8[%c0_17, %c0_18] : memref<16x128xf32, #tpu.memory_space<vmem>>, vector<16x128xf32>
    tpu.vector_store %arg8[%c0_17, %c0_18], %37 {strides = array<i32>} : memref<16x128xf32, #tpu.memory_space<vmem>>, vector<16x128xf32>,
    %cst_19 = arith.constant 0.13333334 : f32
    %39 = vector.broadcast %cst_19 : f32 to vector<1x128xf32>
    %40 = arith.mulf %39, %6 : vector<1x128xf32>
    %cst_20 = arith.constant 1.000000e+00 : f32
    %41 = vector.broadcast %cst_20 : f32 to vector<1x128xf32>
    %42 = arith.subf %41, %40 : vector<1x128xf32>
    %c0_21 = arith.constant 0 : index
    %c0_22 = arith.constant 0 : index
    %43 = vector.load %arg1[%c0_21, %c0_22] : memref<32x1xf32, #tpu.memory_space<vmem>>, vector<32x1xf32>
    %44 = vector.broadcast %43 : vector<32x1xf32> to vector<32x128xf32>
    %45 = vector.broadcast %42 : vector<1x128xf32> to vector<32x128xf32>
    %46 = arith.mulf %44, %45 : vector<32x128xf32>
    %c0_23 = arith.constant 0 : index
    %c0_24 = arith.constant 0 : index
    %47 = vector.load %arg2[%c0_23, %c0_24] : memref<32x1xf32, #tpu.memory_space<vmem>>, vector<32x1xf32>
    %48 = vector.broadcast %47 : vector<32x1xf32> to vector<32x128xf32>
    %49 = arith.addf %46, %48 : vector<32x128xf32>
    %cst_25 = arith.constant 3.000000e+01 : f32
    %50 = vector.broadcast %cst_25 : f32 to vector<32x128xf32>
    %51 = arith.mulf %50, %49 : vector<32x128xf32>
    %52 = math.sin %51 : vector<32x128xf32>
    %c0_26 = arith.constant 0 : index
    %c0_27 = arith.constant 0 : index
    %53 = vector.load %arg3[%c0_26, %c0_27] : memref<32x32xf32, #tpu.memory_space<vmem>>, vector<32x32xf32>
    %cst_28 = arith.constant dense<0.000000e+00> : vector<32x128xf32>
    %54 = tpu.matmul %53, %52, %cst_28 {dimension_numbers = #tpu.dot_dimension_numbers<[1], [0], [0], [1], [0, 0, 1, 1], [], []>} : vector<32x32xf32>, vector<32x128xf32>, vector<32x128xf32> -> vector<32x128xf32>
    %c0_29 = arith.constant 0 : index
    %c0_30 = arith.constant 0 : index
    %55 = vector.load %arg4[%c0_29, %c0_30] : memref<32x1xf32, #tpu.memory_space<vmem>>, vector<32x1xf32>
    %56 = vector.broadcast %55 : vector<32x1xf32> to vector<32x128xf32>
    %57 = arith.addf %54, %56 : vector<32x128xf32>
    %cst_31 = arith.constant 3.000000e+01 : f32
    %58 = vector.broadcast %cst_31 : f32 to vector<32x128xf32>
    %59 = arith.mulf %58, %57 : vector<32x128xf32>
    %60 = math.sin %59 : vector<32x128xf32>
    %c0_32 = arith.constant 0 : index
    %c0_33 = arith.constant 0 : index
    %61 = vector.load %arg5[%c0_32, %c0_33] : memref<16x32xf32, #tpu.memory_space<vmem>>, vector<16x32xf32>
    %cst_34 = arith.constant dense<0.000000e+00> : vector<16x128xf32>
    %62 = tpu.matmul %61, %60, %cst_34 {dimension_numbers = #tpu.dot_dimension_numbers<[1], [0], [0], [1], [0, 0, 1, 1], [], []>} : vector<16x32xf32>, vector<32x128xf32>, vector<16x128xf32> -> vector<16x128xf32>
    %c0_35 = arith.constant 0 : index
    %c0_36 = arith.constant 0 : index
    %63 = vector.load %arg6[%c0_35, %c0_36] : memref<16x1xf32, #tpu.memory_space<vmem>>, vector<16x1xf32>
    %64 = vector.broadcast %63 : vector<16x1xf32> to vector<16x128xf32>
    %65 = arith.addf %62, %64 : vector<16x128xf32>
    %cst_37 = arith.constant 0.000000e+00 : f32
    %66 = vector.shape_cast %5 : vector<1x128xi1> to vector<1x128xi1>
    %67 = vector.broadcast %66 : vector<1x128xi1> to vector<16x128xi1>
    %68 = vector.broadcast %cst_37 : f32 to vector<16x128xf32>
    %69 = arith.select %67, %65, %68 : vector<16x128xi1>, vector<16x128xf32>
    %c0_38 = arith.constant 0 : index
    %c0_39 = arith.constant 0 : index
    %70 = vector.load %arg7[%c0_38, %c0_39] : memref<16x128xf32, #tpu.memory_space<vmem>>, vector<16x128xf32>
    tpu.vector_store %arg7[%c0_38, %c0_39], %69 {strides = array<i32>} : memref<16x128xf32, #tpu.memory_space<vmem>>, vector<16x128xf32>,
    return
  }
  func.func @transform_0(%arg0: i32) -> (i32, i32) {
    %c0_i32 = arith.constant 0 : i32
    %c0_i32_0 = arith.constant 0 : i32
    %c0_i32_1 = arith.constant 0 : i32
    return %c0_i32, %c0_i32_0 : i32, i32
  }
  func.func @transform_1(%arg0: i32) -> (i32, i32) {
    %c0_i32 = arith.constant 0 : i32
    %c0_i32_0 = arith.constant 0 : i32
    %c0_i32_1 = arith.constant 0 : i32
    return %c0_i32, %c0_i32_0 : i32, i32
  }
  func.func @transform_2(%arg0: i32) -> (i32, i32) {
    %c0_i32 = arith.constant 0 : i32
    %c0_i32_0 = arith.constant 0 : i32
    %c0_i32_1 = arith.constant 0 : i32
    return %c0_i32, %c0_i32_0 : i32, i32
  }
  func.func @transform_3(%arg0: i32) -> (i32, i32) {
    %c0_i32 = arith.constant 0 : i32
    %c0_i32_0 = arith.constant 0 : i32
    %c0_i32_1 = arith.constant 0 : i32
    return %c0_i32, %c0_i32_0 : i32, i32
  }
  func.func @transform_4(%arg0: i32) -> (i32, i32) {
    %c0_i32 = arith.constant 0 : i32
    %c0_i32_0 = arith.constant 0 : i32
    %c0_i32_1 = arith.constant 0 : i32
    return %c0_i32, %c0_i32_0 : i32, i32
  }
  func.func @transform_5(%arg0: i32) -> (i32, i32) {
    %c0_i32 = arith.constant 0 : i32
    %c0_i32_0 = arith.constant 0 : i32
    %c0_i32_1 = arith.constant 0 : i32
    return %c0_i32, %c0_i32_0 : i32, i32
  }
  func.func @transform_6(%arg0: i32) -> (i32, i32) {
    %c0_i32 = arith.constant 0 : i32
    %c0_i32_0 = arith.constant 0 : i32
    return %c0_i32, %arg0 : i32, i32
  }
  func.func @transform_7(%arg0: i32) -> (i32, i32) {
    %c0_i32 = arith.constant 0 : i32
    %c0_i32_0 = arith.constant 0 : i32
    return %c0_i32, %arg0 : i32, i32
  }
}

</mosaic_0001>

<bundles_post_ra>
// kernel: tpu_custom_call.1
= control target key start
LH: loop header
LB: loop body
LE: loop exit
PB: predicated region body
PF: predicated region fallthrough
CT: control target
= control target key end

     0   :  { %13 = vsyncpa [#allocation3], 0  ;;  %v2687_v2 = vmov 0   ;;  %s4369_s0 = inlined_call_operand.vmem [shape: f32[32,1], index: 0, kind: input, shape index: {}]   ;;  %s4370_s1 = inlined_call_operand.vmem [shape: f32[32,1], index: 1, kind: input, shape index: {}]   ;;  %s4371_s2 = inlined_call_operand.vmem [shape: f32[32,32], index: 2, kind: input, shape index: {}]   ;;  %s4372_s3 = inlined_call_operand.vmem [shape: f32[32,1], index: 3, kind: input, shape index: {}]   ;;  %s4373_s4 = inlined_call_operand.vmem [shape: f32[16,32], index: 4, kind: input, shape index: {}]   ;;  %s4374_s5 = inlined_call_operand.vmem [shape: f32[16,1], index: 5, kind: input, shape index: {}]   ;;  %s4375_s6 = inlined_call_operand.hbm [shape: f32[16,128], index: 6, kind: output, shape index: {0}]   ;;  %s4376_s7 = inlined_call_operand.hbm [shape: f32[16,128], index: 7, kind: output, shape index: {1}]  }
   0x1   :  { %v64_v0 = vld [vmem:[%s4370_s1] sm:$0xff]  ;;  %2574 = vset.pattern.permute.xlu1 %v2687_v2  ;;  %2573 = vset.pattern.permute.xlu0 %v2687_v2  ;;  %v65_v3 = vld [vmem:[%s4370_s1 + $0x8] sm:$0xff] }
   0x2   :  { %v36_v1 = vld [vmem:[%s4369_s0] sm:$0xff]  ;;  %70 = vperm.xlu1 %2574, %v64_v0   ;;  %v37_v4 = vld [vmem:[%s4369_s0 + $0x8] sm:$0xff] }
   0x3   :  { %42 = vperm.xlu0 %2573, %v36_v1  }
   0x4   :  { %14 = vsyncpa [#allocation5], 0  ;;  %v39_v5 = vld [vmem:[%s4369_s0 + $0x18] sm:$0xff]  ;;  %v38_v6 = vld [vmem:[%s4369_s0 + $0x10] sm:$0xff]  ;;  %v27_v15 = vlaneseq  ;;  %v4396_v57 = vmov 683565275  }
   0x5   :  { %v67_v7 = vld [vmem:[%s4370_s1 + $0x18] sm:$0xff]  ;;  %v66_v8 = vld [vmem:[%s4370_s1 + $0x10] sm:$0xff]  ;;  %v517_v9 = vld [vmem:[%s4372_s3 + $0x8] sm:$0xff]  ;;  %v4385_v59 = vmov 2475754826  }
   0x6   :  { %75 = vperm.xlu1 %2574, %v65_v3   ;;  %v516_v10 = vld [vmem:[%s4372_s3] sm:$0xff]  ;;  %v519_v11 = vld [vmem:[%s4372_s3 + $0x18] sm:$0xff]  ;;  %v518_v12 = vld [vmem:[%s4372_s3 + $0x10] sm:$0xff]  ;;  %v2780_v16 = vand.u32 127, %v27_v15  ;;  %v4383_v63 = vmov 2131351028  }
   0x7   :  { %47 = vperm.xlu0 %2573, %v37_v4   ;;  %v1061_v13 = vld [vmem:[%s4374_s5 + $0x8] sm:$0xff]  ;;  %v1060_v14 = vld [vmem:[%s4374_s5] sm:$0xff]  ;;  %v4408_v2 = vmov 2102212464  }
   0x8   :  { %4422 = vst [vmem:[#allocation8_spill] sm:$0xff] %v2780_v16  ;;  %v33_v19 = vcvt.s32.f32 %v2780_v16 }
   0xa   :  { %57 = vperm.xlu1 %2574, %v39_v5   ;;  %v34_v22 = vmul.f32 0.13333334, %v33_v19 }
   0xb   :  { %52 = vperm.xlu0 %2573, %v38_v6  }
   0xc   :  { %v35_v25 = vadd.f32 -1.0, %v34_v22  ;;  %v2797_v50 = vsub.f32 1.0, %v34_v22 }
   0xe   :  { %85 = vperm.xlu1 %2574, %v67_v7  }
   0xf   :  { %80 = vperm.xlu0 %2573, %v66_v8  }
  0x12   :  { %1171 = vperm.xlu1 %2574, %v37_v4  }
  0x13   :  { %1166 = vperm.xlu0 %2573, %v36_v1  }
  0x16   :  { %1199 = vperm.xlu1 %2574, %v65_v3  }
  0x17   :  { %1194 = vperm.xlu0 %2573, %v64_v0  }
  0x1a   :  { %1181 = vperm.xlu1 %2574, %v39_v5   ;;  %v2692_v5 = vmov 920167782  }
  0x1b   :  { %1176 = vperm.xlu0 %2573, %v38_v6  }
  0x1e   :  { %1209 = vperm.xlu1 %2574, %v67_v7  }
  0x1f   :  { %1204 = vperm.xlu0 %2573, %v66_v8   ;;  %v4387_v8 = vmov 1326507024  }
  0x22   :  { %527 = vperm.xlu1 %2574, %v517_v9  }
  0x23   :  { %522 = vperm.xlu0 %2573, %v516_v10  }
  0x26   :  { %537 = vperm.xlu1 %2574, %v519_v11  }
  0x27   :  { %532 = vperm.xlu0 %2573, %v518_v12  }
  0x2a   :  { %1651 = vperm.xlu1 %2574, %v517_v9  }
  0x2b   :  { %1646 = vperm.xlu0 %2573, %v516_v10  }
  0x2e   :  { %1661 = vperm.xlu1 %2574, %v519_v11  }
  0x2f   :  { %1656 = vperm.xlu0 %2573, %v518_v12  }
  0x32   :  { %1069 = vperm.xlu1 %2574, %v1061_v13  }
  0x33   :  { %1064 = vperm.xlu0 %2573, %v1060_v14  }
  0x36   :  { %2192 = vperm.xlu1 %2574, %v1061_v13  }
  0x37   :  { %2187 = vperm.xlu0 %2573, %v1060_v14  }
  0x81   :  { %v71_v17 = vpop.permute.xlu1 %70 }
  0x82   :  { %v43_v18 = vpop.permute.xlu0 %42 }
  0x83   :  { %v60_v34 = vmul.f32 %v43_v18, %v35_v25 }
  0x85   :  { %v2783_v20 = vpop.permute.xlu1 %75  ;;  %v88_v38 = vadd.f32 %v71_v17, %v60_v34 }
  0x86   :  { %v48_v21 = vpop.permute.xlu0 %47 }
  0x87   :  { %v2792_v43 = vmul.f32 30.0, %v88_v38  ;;  %v61_v49 = vmul.f32 %v48_v21, %v35_v25 }
  0x89   :  { %v58_v23 = vpop.permute.xlu1 %57  ;;  %4424 = vst [vmem:[#allocation10_spill] sm:$0xff] %v2792_v43  ;;  %v99_v51 = vand.u32 2139095040, %v2792_v43 }
  0x8a   :  { %v53_v24 = vpop.permute.xlu0 %52  ;;  %v63_v26 = vmul.f32 %v58_v23, %v35_v25 }
  0x8b   :  { %v62_v29 = vmul.f32 %v53_v24, %v35_v25  ;;  %v100_v38 = vshrl.u32 %v99_v51, 23 }
  0x8d   :  { %v86_v27 = vpop.permute.xlu1 %85 }
  0x8e   :  { %v81_v28 = vpop.permute.xlu0 %80  ;;  %v91_v30 = vadd.f32 %v86_v27, %v63_v26 }
  0x8f   :  { %v90_v32 = vadd.f32 %v81_v28, %v62_v29  ;;  %v89_v28 = vadd.f32 %v2783_v20, %v61_v49 }
  0x90   :  { %v2785_v31 = vmul.f32 30.0, %v91_v30 }
  0x91   :  { %v2788_v35 = vmul.f32 30.0, %v90_v32  ;;  %v1172_v55 = vpop.permute.xlu1 %1171 }
  0x92   :  { %4423 = vst [vmem:[#allocation9_spill] sm:$0xff] %v2785_v31  ;;  %v411_v33 = vand.u32 2139095040, %v2785_v31  ;;  %v4381_v39 = vand.u32 2147483647, %v2785_v31  ;;  %v1185_v24 = vmul.f32 %v1172_v55, %v2797_v50 }
  0x93   :  { %v307_v40 = vand.u32 2139095040, %v2788_v35  ;;  %v4382_v46 = vand.u32 2147483647, %v2788_v35 }
  0x94   :  { %v412_v36 = vshrl.u32 %v411_v33, 23  ;;  %v415_v44 = vand.u32 8388607, %v4381_v39 }
  0x95   :  { %v308_v42 = vshrl.u32 %v307_v40, 23  ;;  %v2806_v61 = vand.u32 8388607, %v4382_v46  ;;  %v1200_v21 = vpop.permute.xlu1 %1199 }
  0x96   :  { %v2324_v37 = vadd.s32 4294967169, %v412_v36  ;;  %v416_v52 = vor.u32 8388608, %v415_v44  ;;  %v1213_v32 = vadd.f32 %v1200_v21, %v1185_v24 }
  0x97   :  { %v2320_v47 = vadd.s32 4294967169, %v308_v42  ;;  %v312_v20 = vor.u32 8388608, %v2806_v61 }
  0x98   :  { %v418_v41 = vadd.s32 1, %v2324_v37  ;;  %v2822_v19 = vshll.u32 %v416_v52, 8 }
  0x99   :  { %v314_v54 = vadd.s32 1, %v2320_v47  ;;  %v352_v21 = vshll.u32 %v312_v20, 8 }
  0x9a   :  { %vm419_vm0 = vcmp.gt.s32.totalorder %v418_v41, 0 }
  0x9b   :  { %v420_v45 = vsel %vm419_vm0, %v418_v41, 0  ;;  %vm315_vm1 = vcmp.gt.s32.totalorder %v314_v54, 0 }
  0x9c   :  { %v422_v48 = vand.u32 31, %v420_v45  ;;  %v2800_v56 = vshrl.u32 %v420_v45, 5  ;;  %v316_v15 = vsel %vm315_vm1, %v314_v54, 0 }
  0x9d   :  { %v318_v27 = vand.u32 31, %v316_v15  ;;  %v2853_v44 = vshrl.u32 %v316_v15, 5 }
  0x9e   :  { %v423_v53 = vsub.s32 32, %v422_v48  ;;  %v425_v58 = vshll.u32 %v4396_v57, %v422_v48  ;;  %v428_v60 = vshll.u32 %v4385_v59, %v422_v48  ;;  %v431_v1 = vshll.u32 %v4383_v63, %v422_v48 }
  0x9f   :  { %v434_v4 = vshll.u32 %v4408_v2, %v422_v48  ;;  %v437_v7 = vshll.u32 %v2692_v5, %v422_v48  ;;  %vm440_vm2 = vcmp.lt.s32.totalorder %v2800_v56, 1  ;;  %vm443_vm3 = vcmp.lt.s32.totalorder %v2800_v56, 4 }
  0xa0   :  { %v426_v62 = vshrl.u32 %v4385_v59, %v423_v53  ;;  %v429_v0 = vshrl.u32 %v4383_v63, %v423_v53  ;;  %v432_v3 = vshrl.u32 %v4408_v2, %v423_v53  ;;  %v435_v6 = vshrl.u32 %v2692_v5, %v423_v53 }
  0xa1   :  { %v438_v9 = vshrl.u32 %v4387_v8, %v423_v53  ;;  %vm442_vm4 = vcmp.lt.s32.totalorder %v2800_v56, 3  ;;  %vm441_vm5 = vcmp.lt.s32.totalorder %v2800_v56, 2  ;;  %v424_v40 = vshrl.u32 %v4396_v57, %v423_v53 }
  0xa2   :  { %v427_v10 = vor.u32 %v426_v62, %v425_v58  ;;  %v430_v11 = vor.u32 %v429_v0, %v428_v60  ;;  %v433_v12 = vor.u32 %v432_v3, %v431_v1  ;;  %v436_v13 = vor.u32 %v435_v6, %v434_v4  ;;  %v1167_v6 = vpop.permute.xlu0 %1166 }
  0xa3   :  { %v439_v14 = vor.u32 %v438_v9, %v437_v7  ;;  %v319_v41 = vsub.s32 32, %v318_v27  ;;  %v321_v45 = vshll.u32 %v4396_v57, %v318_v27  ;;  %v324_v47 = vshll.u32 %v4385_v59, %v318_v27 }
  0xa4   :  { %v448_v17 = vsel %vm440_vm2, %v427_v10, %v430_v11  ;;  %v452_v18 = vsel %vm440_vm2, %v430_v11, %v433_v12  ;;  %v449_v22 = vsel %vm443_vm3, %v436_v13, 920167782  ;;  %v445_v42 = vsel %vm443_vm3, %v433_v12, 2102212464 }
  0xa5   :  { %v453_v23 = vsel %vm443_vm3, %v439_v14, 1326507024  ;;  %v450_v25 = vsel %vm442_vm4, %v433_v12, %v449_v22  ;;  %v322_v48 = vshrl.u32 %v4385_v59, %v319_v41  ;;  %v325_v49 = vshrl.u32 %v4383_v63, %v319_v41 }
  0xa6   :  { %v454_v26 = vsel %vm442_vm4, %v436_v13, %v453_v23  ;;  %v451_v29 = vsel %vm441_vm5, %v448_v17, %v450_v25  ;;  %v327_v51 = vshll.u32 %v4383_v63, %v318_v27  ;;  %v328_v52 = vshrl.u32 %v4408_v2, %v319_v41 }
  0xa7   :  { %v455_v30 = vsel %vm441_vm5, %v452_v18, %v454_v26  ;;  %v2845_v36 = vmul.u32.u64.low %v2822_v19, %v451_v29  ;;  %v2846_v37 = vmul.u32.u64.high %v2822_v19, %v451_v29, %v2845_v36  ;;  %v330_v53 = vshll.u32 %v4408_v2, %v318_v27  ;;  %v1195_v29 = vpop.permute.xlu0 %1194 }
  0xa8   :  { %v2841_v33 = vmul.u32.u64.low %v2822_v19, %v455_v30  ;;  %v2842_v34 = vmul.u32.u64.high %v2822_v19, %v455_v30, %v2841_v33  ;;  %v331_v54 = vshrl.u32 %v2692_v5, %v319_v41  ;;  %v333_v55 = vshll.u32 %v2692_v5, %v318_v27 }
  0xa9   :  { %v2864_v58 = vmul.f32 30.0, %v1213_v32  ;;  %v323_v60 = vor.u32 %v322_v48, %v321_v45  ;;  %v326_v61 = vor.u32 %v325_v49, %v324_v47  ;;  %v329_v62 = vor.u32 %v328_v52, %v327_v51 }
  0xaa   :  { %v334_v0 = vshrl.u32 %v4387_v8, %v319_v41  ;;  %v444_v1 = vsel %vm440_vm2, %v424_v40, %v427_v10  ;;  %v446_v3 = vsel %vm442_vm4, %v430_v11, %v445_v42  ;;  %v332_v4 = vor.u32 %v331_v54, %v330_v53 }
  0xab   :  { %4425 = vst [vmem:[#allocation11_spill] sm:$0xff] %v2864_v58  ;;  %vm336_vm6 = vcmp.lt.s32.totalorder %v2853_v44, 1  ;;  %v466_v7 = vadd.s32 1, %v2846_v37  ;;  %vm338_vm7 = vcmp.lt.s32.totalorder %v2853_v44, 3  ;;  %vm339_vm8 = vcmp.lt.s32.totalorder %v2853_v44, 4 }
  0xac   :  { %v335_v9 = vor.u32 %v334_v0, %v333_v55  ;;  %vm465_vm9 = vc.u32 %v2842_v34, %v2845_v36  ;;  %v344_v10 = vsel %vm336_vm6, %v323_v60, %v326_v61  ;;  %v345_v11 = vsel %vm339_vm8, %v332_v4, 920167782 }
  0xad   :  { %v348_v12 = vsel %vm336_vm6, %v326_v61, %v329_v62  ;;  %v447_v13 = vsel %vm441_vm5, %v444_v1, %v446_v3  ;;  %vm337_vm10 = vcmp.lt.s32.totalorder %v2853_v44, 2  ;;  %v346_v14 = vsel %vm338_vm7, %v329_v62, %v345_v11 }
  0xae   :  { %v349_v15 = vsel %vm339_vm8, %v335_v9, 1326507024  ;;  %v347_v17 = vsel %vm337_vm10, %v344_v10, %v346_v14  ;;  %v2312_v22 = vadd.s32 4294967169, %v100_v38  ;;  %v467_v23 = vsel %vm465_vm9, %v466_v7, %v2846_v37 }
  0xaf   :  { %v350_v18 = vsel %vm338_vm7, %v332_v4, %v349_v15  ;;  %v463_v24 = vmul.u32 %v2822_v19, %v447_v13  ;;  %v2898_v25 = vmul.u32.u64.low %v352_v21, %v347_v17  ;;  %v2899_v26 = vmul.u32.u64.high %v352_v21, %v347_v17, %v2898_v25 }
  0xb0   :  { %v351_v56 = vsel %vm337_vm10, %v348_v12, %v350_v18  ;;  %v1327_v27 = vand.u32 2139095040, %v2864_v58  ;;  %v2903_v30 = vmul.f32 30.0, %v89_v28  ;;  %v1184_v38 = vmul.f32 %v1167_v6, %v2797_v50  ;;  %v1182_v6 = vpop.permute.xlu1 %1181 }
  0xb1   :  { %v2905_v32 = vmul.u32.u64.low %v352_v21, %v351_v56  ;;  %v2906_v33 = vmul.u32.u64.high %v352_v21, %v351_v56, %v2905_v32  ;;  %v2909_v37 = vadd.s32 %v467_v23, %v463_v24  ;;  %v106_v20 = vadd.s32 1, %v2312_v22 }
  0xb2   :  { %4426 = vst [vmem:[#allocation12_spill] sm:$0xff] %v2903_v30  ;;  %v1328_v40 = vshrl.u32 %v1327_v27, 23  ;;  %v1212_v42 = vadd.f32 %v1195_v29, %v1184_v38  ;;  %v341_v19 = vsel %vm339_vm8, %v329_v62, 2102212464  ;;  %v203_v47 = vand.u32 2139095040, %v2903_v30 }
  0xb3   :  { %v320_v48 = vshrl.u32 %v4396_v57, %v319_v41  ;;  %v4378_v28 = vand.u32 2147483647, %v2792_v43  ;;  %v469_v49 = vadd.s32 536870912, %v2909_v37  ;;  %vm107_vm11 = vcmp.gt.s32.totalorder %v106_v20, 0 }
  0xb4   :  { %v2354_v45 = vadd.s32 4294967169, %v1328_v40  ;;  %v342_v53 = vsel %vm338_vm7, %v326_v61, %v341_v19  ;;  %v2921_v54 = vmul.f32 30.0, %v1212_v42  ;;  %v362_v55 = vadd.s32 1, %v2899_v26  ;;  %v1210_v42 = vpop.permute.xlu1 %1209 }
  0xb5   :  { %v340_v52 = vsel %vm336_vm6, %v320_v48, %v323_v60  ;;  %v204_v62 = vshrl.u32 %v203_v47, 23  ;;  %vm361_vm13 = vc.u32 %v2906_v33, %v2898_v25  ;;  %v103_v0 = vand.u32 8388607, %v4378_v28 }
  0xb6   :  { %v1334_v51 = vadd.s32 1, %v2354_v45  ;;  %4427 = vst [vmem:[#allocation13_spill] sm:$0xff] %v2921_v54  ;;  %v2928_v1 = vsel %vm107_vm11, %v106_v20, 0  ;;  %v2930_v3 = vshrl.u32 %v469_v49, 30  ;;  %v343_v60 = vsel %vm337_vm10, %v340_v52, %v342_v53 }
  0xb7   :  { %v1223_v4 = vand.u32 2139095040, %v2921_v54  ;;  %v363_v7 = vsel %vm361_vm13, %v362_v55, %v2899_v26  ;;  %v4377_v10 = vand.u32 2147483647, %v2903_v30  ;;  %v2940_v11 = vand.u32 31, %v2928_v1 }
  0xb8   :  { %vm1335_vm12 = vcmp.gt.s32.totalorder %v1334_v51, 0  ;;  %4428 = vst [vmem:[#allocation14_spill] sm:$0xff] %v2930_v3  ;;  %v2316_v12 = vadd.s32 4294967169, %v204_v62  ;;  %v359_v13 = vmul.u32 %v352_v21, %v343_v60  ;;  %v104_v14 = vor.u32 8388608, %v103_v0 }
  0xb9   :  { %v1336_v41 = vsel %vm1335_vm12, %v1334_v51, 0  ;;  %v471_v15 = vshll.u32 %v2930_v3, 30  ;;  %v4380_v44 = vand.u32 2147483647, %v2864_v58  ;;  %v1187_v18 = vmul.f32 %v1182_v6, %v2797_v50 }
  0xba   :  { %v1338_v61 = vand.u32 31, %v1336_v41  ;;  %v2947_v22 = vadd.s32 %v363_v7, %v359_v13  ;;  %v1224_v24 = vshrl.u32 %v1223_v4, 23  ;;  %v2958_v32 = vshrl.u32 %v1336_v41, 5 }
  0xbb   :  { %v1331_v19 = vand.u32 8388607, %v4380_v44  ;;  %v2966_v52 = vshll.u32 %v104_v14, 8  ;;  %v2970_v53 = vand.u32 8388607, %v4377_v10  ;;  %v2973_v55 = vsub.s32 32, %v2940_v11 }
  0xbc   :  { %v2936_v9 = vsub.s32 32, %v1338_v61  ;;  %v1341_v23 = vshll.u32 %v4396_v57, %v1338_v61  ;;  %v1344_v21 = vshll.u32 %v4385_v59, %v1338_v61  ;;  %v1350_v27 = vshll.u32 %v4408_v2, %v1338_v61 }
  0xbd   :  { %v1347_v38 = vshll.u32 %v4383_v63, %v1338_v61  ;;  %v1353_v40 = vshll.u32 %v2692_v5, %v1338_v61  ;;  %v210_v62 = vadd.s32 1, %v2316_v12  ;;  %v2976_v41 = vsub.s32 %v2909_v37, %v471_v15 }
  0xbe   :  { %v1342_v17 = vshrl.u32 %v4385_v59, %v2936_v9  ;;  %v1345_v56 = vshrl.u32 %v4383_v63, %v2936_v9  ;;  %v1348_v26 = vshrl.u32 %v4408_v2, %v2936_v9  ;;  %v1351_v29 = vshrl.u32 %v2692_v5, %v2936_v9 }
  0xbf   :  { %v1354_v20 = vshrl.u32 %v4387_v8, %v2936_v9  ;;  %v1215_v0 = vadd.f32 %v1210_v42, %v1187_v18  ;;  %v365_v60 = vadd.s32 536870912, %v2947_v22  ;;  %vm1356_vm14 = vcmp.lt.s32.totalorder %v2958_v32, 1 }
  0xc0   :  { %v1343_v45 = vor.u32 %v1342_v17, %v1341_v23  ;;  %v1346_v47 = vor.u32 %v1345_v56, %v1344_v21  ;;  %v1352_v48 = vor.u32 %v1351_v29, %v1350_v27  ;;  %v1349_v49 = vor.u32 %v1348_v26, %v1347_v38 }
  0xc1   :  { %v1355_v51 = vor.u32 %v1354_v20, %v1353_v40  ;;  %vm1359_vm15 = vcmp.lt.s32.totalorder %v2958_v32, 4  ;;  %v2350_v61 = vadd.s32 4294967169, %v1224_v24  ;;  %v1332_v4 = vor.u32 8388608, %v1331_v19 }
  0xc2   :  { %vm1358_vm0 = vcmp.lt.s32.totalorder %v2958_v32, 3  ;;  %v1364_v6 = vsel %vm1356_vm14, %v1343_v45, %v1346_v47  ;;  %v1365_v7 = vsel %vm1359_vm15, %v1352_v48, 920167782  ;;  %v122_v37 = vshll.u32 %v4408_v2, %v2940_v11 }
  0xc3   :  { %v1366_v12 = vsel %vm1358_vm0, %v1349_v49, %v1365_v7  ;;  %v1368_v13 = vsel %vm1356_vm14, %v1346_v47, %v1349_v49  ;;  %v1369_v14 = vsel %vm1359_vm15, %v1355_v51, 1326507024  ;;  %vm211_vm1 = vcmp.gt.s32.totalorder %v210_v62, 0 }
  0xc4   :  { %v474_v15 = vsub.s32 0, %v2976_v41  ;;  %vm1357_vm2 = vcmp.lt.s32.totalorder %v2958_v32, 2  ;;  %v1370_v17 = vsel %vm1358_vm0, %v1352_v48, %v1369_v14  ;;  %v123_v18 = vshrl.u32 %v2692_v5, %v2973_v55 }
  0xc5   :  { %v3000_v23 = vshrl.u32 %v365_v60, 30  ;;  %v1367_v56 = vsel %vm1357_vm2, %v1364_v6, %v1366_v12  ;;  %v1230_v24 = vadd.s32 1, %v2350_v61  ;;  %v3006_v21 = vshrl.u32 %v4387_v8, %v2973_v55 }
  0xc6   :  { %v1371_v26 = vsel %vm1357_vm2, %v1368_v13, %v1370_v17  ;;  %v3010_v27 = vshll.u32 %v1332_v4, 8  ;;  %v3012_v29 = vmul.f32 30.0, %v1215_v0  ;;  %v212_v38 = vsel %vm211_vm1, %v210_v62, 0 }
  0xc7   :  { %4429 = vst [vmem:[#allocation15_spill] sm:$0xff] %v3000_v23  ;;  %v1361_v40 = vsel %vm1359_vm15, %v1349_v49, 2102212464  ;;  %v4379_v20 = vand.u32 2147483647, %v2921_v54  ;;  %vm1231_vm3 = vcmp.gt.s32.totalorder %v1230_v24, 0  ;;  %v2325_v42 = vmin.u32 %v474_v15, %v2976_v41 }
  0xc8   :  { %4430 = vst [vmem:[#allocation16_spill] sm:$0xff] %v3012_v29  ;;  %v1340_v19 = vshrl.u32 %v4396_v57, %v2936_v9  ;;  %v3021_v48 = vmul.u32.u64.low %v3010_v27, %v1367_v56  ;;  %v3022_v51 = vmul.u32.u64.high %v3010_v27, %v1367_v56, %v3021_v48  ;;  %v367_v0 = vshll.u32 %v3000_v23, 30 }
  0xc9   :  { %v3027_v62 = vmul.u32.u64.low %v3010_v27, %v1371_v26  ;;  %v3028_v60 = vmul.u32.u64.high %v3010_v27, %v1371_v26, %v3027_v62  ;;  %v1232_v49 = vsel %vm1231_vm3, %v1230_v24, 0  ;;  %v3032_v61 = vshll.u32 %v2692_v5, %v2940_v11 }
  0xca   :  { %v1360_v4 = vsel %vm1356_vm14, %v1340_v19, %v1343_v45  ;;  %v1362_v9 = vsel %vm1358_vm0, %v1346_v47, %v1361_v40  ;;  %v1535_v6 = vand.u32 2139095040, %v3012_v29  ;;  %v3040_v7 = vshrl.u32 %v2928_v1, 5 }
  0xcb   :  { %v3042_v12 = vshrl.u32 %v212_v38, 5  ;;  %v1234_v13 = vand.u32 31, %v1232_v49  ;;  %v3045_v15 = vor.u32 %v123_v18, %v122_v37  ;;  %v3049_v56 = vand.u32 31, %v212_v38 }
  0xcc   :  { %v1227_v45 = vand.u32 8388607, %v4379_v20  ;;  %v476_v47 = vclz %v2325_v42  ;;  %v3054_v24 = vsub.s32 %v2947_v22, %v367_v0  ;;  %v1363_v1 = vsel %vm1357_vm2, %v1360_v4, %v1362_v9 }
  0xcd   :  { %v1235_v26 = vsub.s32 32, %v1234_v13  ;;  %v1382_v40 = vadd.s32 1, %v3022_v51  ;;  %v1233_v37 = vshrl.u32 %v1232_v49, 5  ;;  %v1237_v18 = vshll.u32 %v4396_v57, %v1234_v13 }
  0xce   :  { %v1536_v19 = vshrl.u32 %v1535_v6, 23  ;;  %v1240_v62 = vshll.u32 %v4385_v59, %v1234_v13  ;;  %v1243_v42 = vshll.u32 %v4383_v63, %v1234_v13  ;;  %v1246_v32 = vshll.u32 %v4408_v2, %v1234_v13 }
  0xcf   :  { %v1238_v38 = vshrl.u32 %v4385_v59, %v1235_v26  ;;  %v1241_v10 = vshrl.u32 %v4383_v63, %v1235_v26  ;;  %v1244_v22 = vshrl.u32 %v4408_v2, %v1235_v26  ;;  %v1247_v0 = vshrl.u32 %v2692_v5, %v1235_v26 }
  0xd0   :  { %v1250_v4 = vshrl.u32 %v4387_v8, %v1235_v26  ;;  %vm1381_vm4 = vc.u32 %v3028_v60, %v3021_v48  ;;  %v1249_v6 = vshll.u32 %v2692_v5, %v1234_v13  ;;  %v2326_v28 = vadd.s32 4294967294, %v476_v47 }
  0xd1   :  { %v1239_v49 = vor.u32 %v1238_v38, %v1237_v18  ;;  %v1242_v9 = vor.u32 %v1241_v10, %v1240_v62  ;;  %v1228_v20 = vor.u32 8388608, %v1227_v45  ;;  %v1245_v44 = vor.u32 %v1244_v22, %v1243_v42 }
  0xd2   :  { %v1248_v39 = vor.u32 %v1247_v0, %v1246_v32  ;;  %vm131_vm5 = vcmp.lt.s32.totalorder %v3040_v7, 4  ;;  %v370_v46 = vsub.s32 0, %v3054_v24  ;;  %v1379_v14 = vmul.u32 %v3010_v27, %v1363_v1  ;;  %v1177_v32 = vpop.permute.xlu0 %1176 }
  0xd3   :  { %v1251_v17 = vor.u32 %v1250_v4, %v1249_v6  ;;  %vm1252_vm6 = vcmp.lt.s32.totalorder %v1233_v37, 1  ;;  %v1383_v63 = vsel %vm1381_vm4, %v1382_v40, %v3022_v51  ;;  %vm1255_vm7 = vcmp.lt.s32.totalorder %v1233_v37, 4 }
  0xd4   :  { %v1260_v59 = vsel %vm1252_vm6, %v1239_v49, %v1242_v9  ;;  %v2362_v18 = vadd.s32 4294967169, %v1536_v19  ;;  %v1236_v10 = vshrl.u32 %v4396_v57, %v1235_v26  ;;  %vm1254_vm8 = vcmp.lt.s32.totalorder %v1233_v37, 3 }
  0xd5   :  { %v1257_v13 = vsel %vm1255_vm7, %v1245_v44, 2102212464  ;;  %v1261_v45 = vsel %vm1255_vm7, %v1248_v39, 920167782  ;;  %vm1253_vm9 = vcmp.lt.s32.totalorder %v1233_v37, 2  ;;  %v1264_v38 = vsel %vm1252_vm6, %v1242_v9, %v1245_v44 }
  0xd6   :  { %v1262_v47 = vsel %vm1254_vm8, %v1245_v44, %v1261_v45  ;;  %v1268_v62 = vshll.u32 %v1228_v20, 8  ;;  %v3076_v42 = vadd.s32 %v1383_v63, %v1379_v14  ;;  %v1256_v22 = vsel %vm1252_vm6, %v1236_v10, %v1239_v49 }
  0xd7   :  { %v1263_v27 = vsel %vm1253_vm9, %v1260_v59, %v1262_v47  ;;  %v1265_v1 = vsel %vm1255_vm7, %v1251_v17, 1326507024  ;;  %v1258_v51 = vsel %vm1254_vm8, %v1242_v9, %v1257_v13  ;;  %v3084_v26 = vsub.s32 32, %v3049_v56  ;;  %v1205_v47 = vpop.permute.xlu0 %1204 }
  0xd8   :  { %v1266_v40 = vsel %vm1254_vm8, %v1248_v39, %v1265_v1  ;;  %v3079_v0 = vmul.u32.u64.low %v1268_v62, %v1263_v27  ;;  %v3080_v19 = vmul.u32.u64.high %v1268_v62, %v1263_v27, %v3079_v0  ;;  %v2321_v4 = vmin.u32 %v370_v46, %v3054_v24 }
  0xd9   :  { %v1267_v44 = vsel %vm1253_vm9, %v1264_v38, %v1266_v40  ;;  %v1542_v63 = vadd.s32 1, %v2362_v18  ;;  %v226_v20 = vshll.u32 %v4408_v2, %v3049_v56  ;;  %vm2327_vm10 = vcmp.lt.s32.totalorder %v2326_v28, 0 }
  0xda   :  { %v3090_v59 = vmul.u32.u64.low %v1268_v62, %v1267_v44  ;;  %v3091_v14 = vmul.u32.u64.high %v1268_v62, %v1267_v44, %v3090_v59  ;;  %v1385_v39 = vadd.s32 536870912, %v3076_v42  ;;  %v1259_v17 = vsel %vm1253_vm9, %v1256_v22, %v1258_v51 }
  0xdb   :  { %v4389_v49 = vand.u32 2147483647, %v3012_v29  ;;  %vm1543_vm11 = vcmp.gt.s32.totalorder %v1542_v63, 0  ;;  %v3099_v46 = vsel %vm131_vm5, %v3045_v15, 920167782  ;;  %v3103_v9 = vshll.u32 %v2692_v5, %v3049_v56 }
  0xdc   :  { %v1278_v6 = vadd.s32 1, %v3080_v19  ;;  %v1544_v18 = vsel %vm1543_vm11, %v1542_v63, 0  ;;  %v227_v10 = vshrl.u32 %v2692_v5, %v3084_v26  ;;  %v3108_v37 = vsel %vm2327_vm10, 0, %v2326_v28 }
  0xdd   :  { %v372_v13 = vclz %v2321_v4  ;;  %v1546_v45 = vand.u32 31, %v1544_v18  ;;  %v3112_v38 = vshrl.u32 %v4387_v8, %v3084_v26  ;;  %v1275_v22 = vmul.u32 %v1268_v62, %v1259_v17 }
  0xde   :  { %vm1277_vm12 = vc.u32 %v3091_v14, %v3079_v0  ;;  %v1186_v27 = vmul.f32 %v1177_v32, %v2797_v50  ;;  %v3117_v1 = vshrl.u32 %v1385_v39, 30  ;;  %v1539_v28 = vand.u32 8388607, %v4389_v49 }
  0xdf   :  { %v1279_v51 = vsel %vm1277_vm12, %v1278_v6, %v3080_v19  ;;  %v1547_v40 = vsub.s32 32, %v1546_v45  ;;  %v464_v4 = vadd.s32 %v2845_v36, %v2842_v34  ;;  %v480_v44 = vsub.s32 32, %v3108_v37 }
  0xe0   :  { %4431 = vst [vmem:[#allocation17_spill] sm:$0xff] %v3117_v1  ;;  %v1280_v63 = vadd.s32 %v1279_v51, %v1275_v22  ;;  %v1214_v62 = vadd.f32 %v1205_v47, %v1186_v27  ;;  %v484_v59 = vsub.s32 4294967266, %v3108_v37  ;;  %v2322_v17 = vadd.s32 4294967294, %v372_v13 }
  0xe1   :  { %v4432_v8 = vmov 2475754826   ;;  %v4433_v32 = vmov 2131351028   ;;  %v1549_v19 = vshll.u32 %v4396_v57, %v1546_v45  ;;  %v1556_v49 = vshrl.u32 %v4408_v2, %v1547_v40 }
  0xe2   :  { %v1550_v50 = vshrl.u32 %v4432_v8, %v1547_v40  ;;  %v1553_v39 = vshrl.u32 %v4433_v32, %v1547_v40  ;;  %v1552_v6 = vshll.u32 %v4432_v8, %v1546_v45  ;;  %v1559_v16 = vshrl.u32 %v2692_v5, %v1547_v40 }
  0xe3   :  { %v1387_v34 = vshll.u32 %v3117_v1, 30  ;;  %v1540_v36 = vor.u32 8388608, %v1539_v28  ;;  %v1545_v22 = vshrl.u32 %v1544_v18, 5  ;;  %v1558_v47 = vshll.u32 %v4408_v2, %v1546_v45 }
  0xe4   :  { %v1281_v27 = vadd.s32 536870912, %v1280_v63  ;;  %v1551_v13 = vor.u32 %v1550_v50, %v1549_v19  ;;  %v1554_v51 = vor.u32 %v1553_v39, %v1552_v6  ;;  %v1555_v30 = vshll.u32 %v4433_v32, %v1546_v45 }
  0xe5   :  { %v1560_v29 = vor.u32 %v1559_v16, %v1558_v47  ;;  %v1561_v57 = vshll.u32 %v2692_v5, %v1546_v45  ;;  %v4434_v3 = vmov 1326507024   ;;  %v3137_v54 = vmul.f32 30.0, %v1214_v62 }
  0xe6   :  { %v1562_v23 = vshrl.u32 %v4434_v3, %v1547_v40  ;;  %v3139_v43 = vor.u32 %v227_v10, %v226_v20  ;;  %v231_v28 = vor.u32 %v3112_v38, %v3103_v9  ;;  %v482_v18 = vshrl.u32 %v464_v4, %v480_v44 }
  0xe7   :  { %4435 = vst [vmem:[#allocation18_spill] sm:$0xff] %v3137_v54  ;;  %v1557_v1 = vor.u32 %v1556_v49, %v1555_v30  ;;  %v485_v2 = vadd.s32 127, %v484_v59  ;;  %v3144_v50 = vsub.s32 %v3076_v42, %v1387_v34  ;;  %vm1564_vm13 = vcmp.lt.s32.totalorder %v1545_v22, 1 }
  0xe8   :  { %v1563_v39 = vor.u32 %v1562_v23, %v1561_v57  ;;  %vm235_vm14 = vcmp.lt.s32.totalorder %v3042_v12, 4  ;;  %vm2323_vm15 = vcmp.lt.s32.totalorder %v2322_v17, 0  ;;  %v3147_v16 = vshrl.u32 %v1281_v27, 30 }
  0xe9   :  { %vm1567_vm0 = vcmp.lt.s32.totalorder %v1545_v22, 4  ;;  %v1572_v20 = vsel %vm1564_vm13, %v1551_v13, %v1554_v51  ;;  %vm1566_vm1 = vcmp.lt.s32.totalorder %v1545_v22, 3  ;;  %v1580_v45 = vshll.u32 %v1540_v36, 8 }
  0xea   :  { %4436 = vst [vmem:[#allocation19_spill] sm:$0xff] %v3147_v16  ;;  %v1573_v10 = vsel %vm1567_vm0, %v1560_v29, 920167782  ;;  %v1431_v9 = vand.u32 2139095040, %v3137_v54  ;;  %vm1565_vm2 = vcmp.lt.s32.totalorder %v1545_v22, 2  ;;  %v1576_v57 = vsel %vm1564_vm13, %v1554_v51, %v1557_v1 }
  0xeb   :  { %v1569_v30 = vsel %vm1567_vm0, %v1557_v1, 2102212464  ;;  %v1574_v42 = vsel %vm1566_vm1, %v1557_v1, %v1573_v10  ;;  %v1390_v23 = vsub.s32 0, %v3144_v50  ;;  %v4437_v49 = vmov 683565275  }
  0xec   :  { %v1548_v38 = vshrl.u32 %v4437_v49, %v1547_v40  ;;  %v1575_v4 = vsel %vm1565_vm2, %v1572_v20, %v1574_v42  ;;  %v1577_v44 = vsel %vm1567_vm0, %v1563_v39, 1326507024  ;;  %v1283_v62 = vshll.u32 %v3147_v16, 30 }
  0xed   :  { %v1578_v59 = vsel %vm1566_vm1, %v1560_v29, %v1577_v44  ;;  %v3158_v19 = vmul.u32.u64.low %v1580_v45, %v1575_v4  ;;  %v3159_v6 = vmul.u32.u64.high %v1580_v45, %v1575_v4, %v3158_v19  ;;  %v1570_v36 = vsel %vm1566_vm1, %v1554_v51, %v1569_v30 }
  0xee   :  { %v1568_v34 = vsel %vm1564_vm13, %v1548_v38, %v1551_v13  ;;  %v1579_v1 = vsel %vm1565_vm2, %v1576_v57, %v1578_v59  ;;  %v1432_v47 = vshrl.u32 %v1431_v9, 23  ;;  %v4438_v40 = vor.u32 %v3006_v21, %v3032_v61 }
  0xef   :  { %v486_v39 = vshll.u32 %v485_v2, 23  ;;  %v3172_v29 = vmul.u32.u64.low %v1580_v45, %v1579_v1  ;;  %v3173_v20 = vmul.u32.u64.high %v1580_v45, %v1579_v1, %v3172_v29  ;;  %v481_v10 = vshll.u32 %v2976_v41, %v3108_v37 }
  0xf0   :  { %v3170_v27 = vsel %vm131_vm5, %v4438_v40, 1326507024  ;;  %v3178_v13 = vsel %vm2323_vm15, 0, %v2322_v17  ;;  %v2355_v51 = vmin.u32 %v1390_v23, %v3144_v50  ;;  %v2358_v9 = vadd.s32 4294967169, %v1432_v47 }
  0xf1   :  { %v3181_v30 = vsub.s32 %v1280_v63, %v1283_v62  ;;  %v1571_v21 = vsel %vm1565_vm2, %v1568_v34, %v1570_v36  ;;  %v1590_v61 = vadd.s32 1, %v3159_v6  ;;  %v4410_v2 = vand.u32 2147483647, %v3137_v54 }
  0xf2   :  { %v3189_v42 = vsel %vm235_vm14, %v3139_v43, 920167782  ;;  %v3193_v41 = vsel %vm235_vm14, %v231_v28, 1326507024  ;;  %v3195_v37 = vor.u32 %v482_v18, %v481_v10  ;;  %v1438_v17 = vadd.s32 1, %v2358_v9 }
  0xf3   :  { %4439 = vst [vmem:[#allocation20_spill] sm:$0xff] %v3181_v30  ;;  %v3197_v63 = vor.u32 4788187, %v486_v39  ;;  %vm1589_vm3 = vc.u32 %v3173_v20, %v3158_v19  ;;  %v3203_v22 = vshrl.u32 %v4437_v49, %v2973_v55  ;;  %v114_v57 = vshrl.u32 %v4432_v8, %v2973_v55 }
  0xf4   :  { %v376_v23 = vsub.s32 32, %v3178_v13  ;;  %v1587_v38 = vmul.u32 %v1580_v45, %v1571_v21  ;;  %v1591_v28 = vsel %vm1589_vm3, %v1590_v61, %v3159_v6  ;;  %vm1439_vm4 = vcmp.gt.s32.totalorder %v1438_v17, 0 }
  0xf5   :  { %v1392_v18 = vclz %v2355_v51  ;;  %v1286_v4 = vsub.s32 0, %v3181_v30  ;;  %v1435_v44 = vand.u32 8388607, %v4410_v2  ;;  %v113_v62 = vshll.u32 %v4437_v49, %v2940_v11 }
  0xf6   :  { %v360_v34 = vadd.s32 %v2898_v25, %v2906_v33  ;;  %v1592_v36 = vadd.s32 %v1591_v28, %v1587_v38  ;;  %v1440_v1 = vsel %vm1439_vm4, %v1438_v17, 0  ;;  %v116_v51 = vshll.u32 %v4432_v8, %v2940_v11 }
  0xf7   :  { %v1442_v40 = vand.u32 31, %v1440_v1  ;;  %v3223_v10 = vor.u32 %v114_v57, %v113_v62  ;;  %v3227_v9 = vadd.s32 4294967294, %v1392_v18  ;;  %v3230_v25 = vmin.u32 %v1286_v4, %v3181_v30 }
  0xf8   :  { %v3221_v39 = vshrl.u32 %v360_v34, %v376_v23  ;;  %v1593_v29 = vadd.s32 536870912, %v1592_v36  ;;  %v1436_v33 = vor.u32 8388608, %v1435_v44  ;;  %v1441_v17 = vshrl.u32 %v1440_v1, 5 }
  0xf9   :  { %v1443_v21 = vsub.s32 32, %v1442_v40  ;;  %v1445_v38 = vshll.u32 %v4437_v49, %v1442_v40  ;;  %v117_v23 = vshrl.u32 %v4433_v32, %v2973_v55  ;;  %v1448_v28 = vshll.u32 %v4432_v8, %v1442_v40 }
  0xfa   :  { %v3232_v61 = vshrl.u32 %v1593_v29, 30  ;;  %v1451_v18 = vshll.u32 %v4433_v32, %v1442_v40  ;;  %v4441_v62 = vmov 2102212464   ;;  %v1288_v2 = vclz %v3230_v25 }
  0xfb   :  { %v1446_v57 = vshrl.u32 %v4432_v8, %v1443_v21  ;;  %v1454_v34 = vshll.u32 %v4441_v62, %v1442_v40  ;;  %v1449_v44 = vshrl.u32 %v4433_v32, %v1443_v21  ;;  %v1452_v29 = vshrl.u32 %v4441_v62, %v1443_v21 }
  0xfc   :  { %4440 = vst [vmem:[#allocation21_spill] sm:$0xff] %v3232_v61  ;;  %v1595_v4 = vshll.u32 %v3232_v61, 30  ;;  %v1455_v1 = vshrl.u32 %v2692_v5, %v1443_v21  ;;  %v1457_v59 = vshll.u32 %v2692_v5, %v1442_v40  ;;  %v1458_v45 = vshrl.u32 %v4434_v3, %v1443_v21 }
  0xfd   :  { %v1447_v6 = vor.u32 %v1446_v57, %v1445_v38  ;;  %vm2357_vm6 = vcmp.lt.s32.totalorder %v3227_v9, 0  ;;  %v1450_v16 = vor.u32 %v1449_v44, %v1448_v28  ;;  %v1453_v54 = vor.u32 %v1452_v29, %v1451_v18 }
  0xfe   :  { %v3249_v47 = vsub.s32 %v1592_v36, %v1595_v4  ;;  %v1456_v61 = vor.u32 %v1455_v1, %v1454_v34  ;;  %v1459_v58 = vor.u32 %v1458_v45, %v1457_v59  ;;  %v1476_v31 = vshll.u32 %v1436_v33, 8 }
  0xff   :  { %v119_v30 = vshll.u32 %v4433_v32, %v2940_v11  ;;  %v120_v25 = vshrl.u32 %v4441_v62, %v2973_v55  ;;  %v1444_v38 = vshrl.u32 %v4437_v49, %v1443_v21  ;;  %vm1460_vm7 = vcmp.lt.s32.totalorder %v1441_v17, 1 }
 0x100   :  { %vm1463_vm8 = vcmp.lt.s32.totalorder %v1441_v17, 4  ;;  %v118_v40 = vor.u32 %v117_v23, %v116_v51  ;;  %vm1461_vm9 = vcmp.lt.s32.totalorder %v1441_v17, 2  ;;  %vm1462_vm10 = vcmp.lt.s32.totalorder %v1441_v17, 3 }
 0x101   :  { %v1468_v36 = vsel %vm1460_vm7, %v1447_v6, %v1450_v16  ;;  %v1469_v57 = vsel %vm1463_vm8, %v1456_v61, 920167782  ;;  %v1598_v28 = vsub.s32 0, %v3249_v47  ;;  %v1465_v18 = vsel %vm1463_vm8, %v1453_v54, 2102212464 }
 0x102   :  { %v1470_v59 = vsel %vm1462_vm10, %v1453_v54, %v1469_v57  ;;  %v1472_v45 = vsel %vm1460_vm7, %v1450_v16, %v1453_v54  ;;  %v1473_v11 = vsel %vm1463_vm8, %v1459_v58, 1326507024  ;;  %v121_v34 = vor.u32 %v120_v25, %v119_v30 }
 0x103   :  { %v1471_v33 = vsel %vm1461_vm9, %v1468_v36, %v1470_v59  ;;  %vm128_vm11 = vcmp.lt.s32.totalorder %v3040_v7, 1  ;;  %v1464_v55 = vsel %vm1460_vm7, %v1444_v38, %v1447_v6  ;;  %v1474_v21 = vsel %vm1462_vm10, %v1456_v61, %v1473_v11 }
 0x104   :  { %vm129_vm12 = vcmp.lt.s32.totalorder %v3040_v7, 2  ;;  %v136_v51 = vsel %vm128_vm11, %v3223_v10, %v118_v40  ;;  %v1466_v23 = vsel %vm1462_vm10, %v1450_v16, %v1465_v18  ;;  %v1475_v4 = vsel %vm1461_vm9, %v1472_v45, %v1474_v21 }
 0x105   :  { %v3264_v44 = vmul.u32.u64.low %v1476_v31, %v1471_v33  ;;  %v3265_v29 = vmul.u32.u64.high %v1476_v31, %v1471_v33, %v3264_v44  ;;  %v2363_v58 = vmin.u32 %v1598_v28, %v3249_v47  ;;  %vm130_vm13 = vcmp.lt.s32.totalorder %v3040_v7, 3 }
 0x106   :  { %v3269_v54 = vmul.u32.u64.low %v1476_v31, %v1475_v4  ;;  %v3270_v30 = vmul.u32.u64.high %v1476_v31, %v1475_v4, %v3269_v54  ;;  %v133_v6 = vsel %vm131_vm5, %v121_v34, 2102212464  ;;  %v138_v16 = vsel %vm130_vm13, %v121_v34, %v3099_v46 }
 0x107   :  { %v140_v61 = vsel %vm128_vm11, %v118_v40, %v121_v34  ;;  %v142_v1 = vsel %vm130_vm13, %v3045_v15, %v3170_v27  ;;  %v4442_v25 = vsub.s32 4294967266, %v3178_v13  ;;  %v1467_v36 = vsel %vm1461_vm9, %v1464_v55, %v1466_v23 }
 0x108   :  { %v139_v57 = vsel %vm129_vm12, %v136_v51, %v138_v16  ;;  %v143_v28 = vsel %vm129_vm12, %v140_v61, %v142_v1  ;;  %v3294_v46 = vsel %vm2357_vm6, 0, %v3227_v9  ;;  %v1486_v18 = vadd.s32 1, %v3265_v29 }
 0x109   :  { %v381_v38 = vadd.s32 127, %v4442_v25  ;;  %v3298_v15 = vmul.u32.u64.low %v2966_v52, %v143_v28  ;;  %v3299_v27 = vmul.u32.u64.high %v2966_v52, %v143_v28, %v3298_v15  ;;  %v2352_v59 = vadd.s32 4294967294, %v1288_v2 }
 0x10a   :  { %v1600_v17 = vclz %v2363_v58  ;;  %v132_v45 = vsel %vm128_vm11, %v3203_v22, %v3223_v10  ;;  %v134_v33 = vsel %vm130_vm13, %v118_v40, %v133_v6  ;;  %v1483_v11 = vmul.u32 %v1476_v31, %v1467_v36 }
 0x10b   :  { %vm1485_vm5 = vc.u32 %v3270_v30, %v3264_v44  ;;  %v3310_v9 = vmul.u32.u64.low %v2966_v52, %v139_v57  ;;  %v3311_v34 = vmul.u32.u64.high %v2966_v52, %v139_v57, %v3310_v9  ;;  %v4443_v2 = vand.u32 2147483647, %v3197_v63 }
 0x10c   :  { %v4444_v55 = vcvt.s32.f32 %v3195_v37  ;;  %v4445_v22 = vshll.u32 %v3054_v24, %v3178_v13  ;;  %v382_v31 = vshll.u32 %v381_v38, 23  ;;  %v1487_v40 = vsel %vm1485_vm5, %v1486_v18, %v3265_v29 }
 0x10d   :  { %v1380_v51 = vadd.s32 %v3021_v48, %v3028_v60  ;;  %v1400_v23 = vsub.s32 4294967266, %v3294_v46  ;;  %v1488_v4 = vadd.s32 %v1487_v40, %v1483_v11  ;;  %v135_v37 = vsel %vm129_vm12, %v132_v45, %v134_v33 }
 0x10e   :  { %v3318_v21 = vmul.f32 %v4444_v55, %v4443_v2  ;;  %v3324_v10 = vor.u32 %v3221_v39, %v4445_v22  ;;  %vm2353_vm15 = vcmp.lt.s32.totalorder %v2352_v59, 0  ;;  %v2364_v63 = vadd.s32 4294967294, %v1600_v17 }
 0x10f   :  { %vm153_vm0 = vc.u32 %v3299_v27, %v3310_v9  ;;  %v218_v24 = vshrl.u32 %v4432_v8, %v3084_v26  ;;  %v1489_v13 = vadd.s32 536870912, %v1488_v4  ;;  %v154_v39 = vadd.s32 1, %v3311_v34 }
 0x110   :  { %v220_v48 = vshll.u32 %v4432_v8, %v3049_v56  ;;  %v221_v60 = vshrl.u32 %v4433_v32, %v3084_v26  ;;  %v151_v7 = vmul.u32 %v2966_v52, %v135_v37  ;;  %v217_v29 = vshll.u32 %v4437_v49, %v3049_v56 }
 0x111   :  { %v223_v58 = vshll.u32 %v4433_v32, %v3049_v56  ;;  %v224_v54 = vshrl.u32 %v4441_v62, %v3084_v26  ;;  %v3348_v6 = vsel %vm2353_vm15, 0, %v2352_v59  ;;  %v3350_v16 = vshrl.u32 %v1489_v13, 30 }
 0x112   :  { %v155_v61 = vsel %vm153_vm0, %v154_v39, %v3311_v34  ;;  %v222_v1 = vor.u32 %v221_v60, %v220_v48  ;;  %v383_v25 = vor.u32 4788187, %v382_v31  ;;  %v219_v36 = vor.u32 %v218_v24, %v217_v29 }
 0x113   :  { %v156_v38 = vadd.s32 %v155_v61, %v151_v7  ;;  %v225_v52 = vor.u32 %v224_v54, %v223_v58  ;;  %v386_v57 = vcvt.s32.f32 %v3324_v10  ;;  %v1396_v28 = vsub.s32 32, %v3294_v46 }
 0x114   :  { %v1401_v18 = vadd.s32 127, %v1400_v23  ;;  %v1491_v56 = vshll.u32 %v3350_v16, 30  ;;  %v1296_v15 = vsub.s32 4294967266, %v3348_v6  ;;  %vm2365_vm1 = vcmp.lt.s32.totalorder %v2364_v63, 0 }
 0x115   :  { %v157_v59 = vadd.s32 536870912, %v156_v38  ;;  %vm232_vm2 = vcmp.lt.s32.totalorder %v3042_v12, 1  ;;  %vm233_vm3 = vcmp.lt.s32.totalorder %v3042_v12, 2  ;;  %vm234_vm4 = vcmp.lt.s32.totalorder %v3042_v12, 3 }
 0x116   :  { %v3358_v17 = vsub.s32 %v1488_v4, %v1491_v56  ;;  %v244_v45 = vsel %vm232_vm2, %v222_v1, %v225_v52  ;;  %v240_v11 = vsel %vm232_vm2, %v219_v36, %v222_v1  ;;  %v242_v34 = vsel %vm234_vm4, %v225_v52, %v3189_v42 }
 0x117   :  { %v3364_v33 = vshrl.u32 %v157_v59, 30  ;;  %v246_v2 = vsel %vm234_vm4, %v3139_v43, %v3193_v41  ;;  %v3375_v55 = vsel %vm2365_vm1, 0, %v2364_v63  ;;  %v4446_v31 = vor.u32 8388608, %v2970_v53 }
 0x118   :  { %v1494_v22 = vsub.s32 0, %v3358_v17  ;;  %v247_v10 = vsel %vm233_vm3, %v244_v45, %v246_v2  ;;  %v384_v23 = vand.u32 2147483647, %v383_v25  ;;  %v1276_v4 = vadd.s32 %v3079_v0, %v3091_v14  ;;  %v4447_v2 = vld [vmem:[#allocation20_spill] sm:$0xff] }
 0x119   :  { %v248_v40 = vshll.u32 %v4446_v31, 8  ;;  %v1297_v42 = vadd.s32 127, %v1296_v15  ;;  %v159_v37 = vshll.u32 %v3364_v33, 30  ;;  %v243_v43 = vsel %vm233_vm3, %v240_v11, %v242_v34 }
 0x11a   :  { %v2359_v24 = vmin.u32 %v1494_v22, %v3358_v17  ;;  %v1398_v13 = vshrl.u32 %v1380_v51, %v1396_v28  ;;  %v1608_v39 = vsub.s32 4294967266, %v3375_v55  ;;  %v237_v48 = vsel %vm235_vm14, %v225_v52, 2102212464 }
 0x11b   :  { %v3388_v41 = vmul.u32.u64.low %v248_v40, %v247_v10  ;;  %v3389_v63 = vmul.u32.u64.high %v248_v40, %v247_v10, %v3388_v41  ;;  %v3392_v53 = vsub.s32 %v156_v38, %v159_v37  ;;  %v1402_v0 = vshll.u32 %v1401_v18, 23 }
 0x11c   :  { %v1292_v14 = vsub.s32 32, %v3348_v6  ;;  %v1496_v60 = vclz %v2359_v24  ;;  %v216_v7 = vshrl.u32 %v4437_v49, %v3084_v26  ;;  %v1397_v29 = vshll.u32 %v3144_v50, %v3294_v46 }
 0x11d   :  { %v162_v58 = vsub.s32 0, %v3392_v53  ;;  %v3402_v51 = vmul.u32.u64.low %v248_v40, %v243_v43  ;;  %v3403_v54 = vmul.u32.u64.high %v248_v40, %v243_v43, %v3402_v51  ;;  %v1298_v61 = vshll.u32 %v1297_v42, 23 }
 0x11e   :  { %v2360_v25 = vadd.s32 4294967294, %v1496_v60  ;;  %v236_v38 = vsel %vm232_vm2, %v216_v7, %v219_v36  ;;  %v238_v52 = vsel %vm234_vm4, %v222_v1, %v237_v48  ;;  %v492_v28 = vxor.u32 2147483648, %v3318_v21 }
 0x11f   :  { %v387_v26 = vmul.f32 %v386_v57, %v384_v23  ;;  %v1609_v18 = vadd.s32 127, %v1608_v39  ;;  %v2313_v50 = vmin.u32 %v162_v58, %v3392_v53  ;;  %vm306_vm14 = vcmp.lt.s32.totalorder %v2788_v35, 0 }
 0x120   :  { %v1399_v46 = vor.u32 %v1398_v13, %v1397_v29  ;;  %v1403_v56 = vor.u32 4788187, %v1402_v0  ;;  %v1294_v15 = vshrl.u32 %v1276_v4, %v1292_v14  ;;  %vm2361_vm6 = vcmp.lt.s32.totalorder %v2360_v25, 0  ;;  %v4448_v4 = vld [vmem:[#allocation9_spill] sm:$0xff] }
 0x121   :  { %v1604_v59 = vsub.s32 32, %v3375_v55  ;;  %v3414_v45 = vsel %vm2361_vm6, 0, %v2360_v25  ;;  %v164_v36 = vclz %v2313_v50  ;;  %v239_v1 = vsel %vm233_vm3, %v236_v38, %v238_v52 }
 0x122   :  { %v1299_v11 = vor.u32 4788187, %v1298_v61  ;;  %v1588_v57 = vadd.s32 %v3158_v19, %v3173_v20  ;;  %v1504_v34 = vsub.s32 4294967266, %v3414_v45  ;;  %vm257_vm7 = vc.u32 %v3389_v63, %v3402_v51 }
 0x123   :  { %v1293_v22 = vshll.u32 %v4447_v2, %v3348_v6  ;;  %v1610_v10 = vshll.u32 %v1609_v18, 23  ;;  %v2314_v31 = vadd.s32 4294967294, %v164_v36  ;;  %v258_v23 = vadd.s32 1, %v3403_v54 }
 0x124   :  { %vm410_vm8 = vcmp.lt.s32.totalorder %v4448_v4, 0  ;;  %v4449_v12 = vand.u32 2147483647, %v2788_v35  ;;  %v388_v19 = vxor.u32 2147483648, %v387_v26  ;;  %v1404_v20 = vand.u32 2147483647, %v1403_v56 }
 0x125   :  { %v1406_v37 = vcvt.s32.f32 %v1399_v46  ;;  %v255_v24 = vmul.u32 %v248_v40, %v239_v1  ;;  %v1295_v43 = vor.u32 %v1294_v15, %v1293_v22  ;;  %v1606_v41 = vshrl.u32 %v1588_v57, %v1604_v59  ;;  %v4455_v59 = vld [vmem:[#allocation11_spill] sm:$0xff] }
 0x126   :  { %vm3429_vm9 = vcmp.le.f32.partialorder %v4449_v12, 0.7853982  ;;  %vm2315_vm10 = vcmp.lt.s32.totalorder %v2314_v31, 0  ;;  %v259_v6 = vsel %vm257_vm7, %v258_v23, %v3403_v54  ;;  %v1300_v13 = vand.u32 2147483647, %v1299_v11  ;;  %v3469_v23 = vld [vmem:[%s4371_s2] sm:$0xff] }
 0x127   :  { %v1505_v39 = vadd.s32 127, %v1504_v34  ;;  %v167_v48 = vsel %vm2315_vm10, 0, %v2314_v31  ;;  %v260_v0 = vadd.s32 %v259_v6, %v255_v24  ;;  %v1605_v14 = vshll.u32 %v3249_v47, %v3375_v55  ;;  %v4461_v6 = vld [vmem:[#allocation15_spill] sm:$0xff] }
 0x128   :  { %v1611_v60 = vor.u32 4788187, %v1610_v10  ;;  %v168_v7 = vsub.s32 32, %v167_v48  ;;  %v172_v29 = vsub.s32 4294967266, %v167_v48  ;;  %v4452_v58 = vand.u32 2147483647, %v4448_v4 }
 0x129   :  { %v1407_v40 = vmul.f32 %v1406_v37, %v1404_v20  ;;  %v1500_v25 = vsub.s32 32, %v3414_v45  ;;  %v152_v54 = vadd.s32 %v3310_v9, %v3299_v27  ;;  %v261_v38 = vadd.s32 536870912, %v260_v0  ;;  %v4459_v10 = vld [vmem:[#allocation10_spill] sm:$0xff] }
 0x12a   :  { %vm3438_vm11 = vcmp.le.f32.partialorder %v4452_v58, 0.7853982  ;;  %v389_v52 = vsel %vm306_vm14, %v388_v19, %v387_v26  ;;  %v1302_v47 = vcvt.s32.f32 %v1295_v43  ;;  %v1607_v55 = vor.u32 %v1606_v41, %v1605_v14 }
 0x12b   :  { %v173_v18 = vadd.s32 127, %v172_v29  ;;  %v1484_v50 = vadd.s32 %v3264_v44, %v3270_v30  ;;  %v1506_v46 = vshll.u32 %v1505_v39, 23  ;;  %v170_v56 = vshrl.u32 %v152_v54, %v168_v7  ;;  %v4462_v54 = vld [vmem:[#allocation14_spill] sm:$0xff] }
 0x12c   :  { %v3449_v15 = vshrl.u32 %v261_v38, 30  ;;  %v4456_v36 = vand.u32 2147483647, %v4455_v59  ;;  %v1303_v27 = vmul.f32 %v1302_v47, %v1300_v13  ;;  %v1612_v9 = vand.u32 2147483647, %v1611_v60 }
 0x12d   :  { %v174_v11 = vshll.u32 %v173_v18, 23  ;;  %v1408_v26 = vxor.u32 2147483648, %v1407_v40  ;;  %v1502_v57 = vshrl.u32 %v1484_v50, %v1500_v25  ;;  %v169_v34 = vshll.u32 %v3392_v53, %v167_v48 }
 0x12e   :  { %vm3453_vm12 = vcmp.le.f32.partialorder %v4456_v36, 0.7853982  ;;  %v263_v2 = vshll.u32 %v3449_v15, 30  ;;  %v493_v44 = vsel %vm410_vm8, %v492_v28, %v3318_v21  ;;  %v392_v30 = vsel %vm3429_vm9, %v2788_v35, %v389_v52 }
 0x12f   :  { %v1614_v22 = vcvt.s32.f32 %v1607_v55  ;;  %vm98_vm13 = vcmp.lt.s32.totalorder %v4459_v10, 0  ;;  %v175_v31 = vor.u32 4788187, %v174_v11  ;;  %v1501_v53 = vshll.u32 %v3358_v17, %v3414_v45  ;;  %v4460_v45 = vld [vmem:[#allocation13_spill] sm:$0xff]  ;;  %v4466_v55 = vld [vmem:[#allocation16_spill] sm:$0xff] }
 0x130   :  { %v1507_v12 = vor.u32 4788187, %v1506_v46  ;;  %v171_v19 = vor.u32 %v170_v56, %v169_v34  ;;  %v3473_v20 = vsub.s32 %v260_v0, %v263_v2  ;;  %vm1326_vm5 = vcmp.lt.s32.totalorder %v4455_v59, 0 }
 0x131   :  { %v1304_v21 = vxor.u32 2147483648, %v1303_v27  ;;  %v1615_v28 = vmul.f32 %v1614_v22, %v1612_v9  ;;  %vm540_vm15 = vcmask 261120   ;;  %v1409_v37 = vsel %vm1326_vm5, %v1408_v26, %v1407_v40 }
 0x132   :  { %v1503_v24 = vor.u32 %v1502_v57, %v1501_v53  ;;  %v176_v43 = vand.u32 2147483647, %v175_v31  ;;  %v266_v41 = vsub.s32 0, %v3473_v20  ;;  %2424 = vmatprep.mubr.msk.f32.mxu0 %vm540_vm15, %v3469_v23  ;;  %v496_v17 = vsel %vm3438_vm11, %v4448_v4, %v493_v44  ;;  %v4470_v57 = vld [vmem:[#allocation12_spill] sm:$0xff] }
 0x133   :  { %2575 = vcosq.f32 %v392_v30  ;;  %vm1222_vm0 = vcmp.lt.s32.totalorder %v4460_v45, 0  ;;  %v390_v13 = vsub.s32 4, %v4461_v6  ;;  %v1508_v39 = vand.u32 2147483647, %v1507_v12 }
 0x134   :  { %v178_v48 = vcvt.s32.f32 %v171_v19  ;;  %v182_v0 = vsub.s32 4, %v3364_v33  ;;  %v2317_v14 = vmin.u32 %v266_v41, %v3473_v20  ;;  %2577 = vsinq.f32 %v392_v30 }
 0x135   :  { %v1412_v60 = vsel %vm3453_vm12, %v4455_v59, %v1409_v37  ;;  %v1305_v7 = vsel %vm1222_vm0, %v1304_v21, %v1303_v27  ;;  %v1616_v29 = vxor.u32 2147483648, %v1615_v28  ;;  %v1510_v58 = vcvt.s32.f32 %v1503_v24 }
 0x136   :  { %v179_v40 = vmul.f32 %v178_v48, %v176_v43  ;;  %v268_v25 = vclz %v2317_v14  ;;  %v494_v38 = vsub.s32 4, %v4462_v54  ;;  %2579 = vcosq.f32 %v496_v17 }
 0x137   :  { %v4463_v52 = vand.u32 2147483647, %v4460_v45  ;;  %vm1534_vm2 = vcmp.lt.s32.totalorder %v4466_v55, 0  ;;  %v391_v18 = vsel %vm306_vm14, %v390_v13, %v4461_v6  ;;  %2581 = vsinq.f32 %v496_v17  ;;  %v4477_v13 = vld [vmem:[#allocation18_spill] sm:$0xff] }
 0x138   :  { %v1511_v50 = vmul.f32 %v1510_v58, %v1508_v39  ;;  %v183_v46 = vsel %vm98_vm13, %v182_v0, %v3364_v33  ;;  %v2318_v56 = vadd.s32 4294967294, %v268_v25  ;;  %2583 = vcosq.f32 %v1412_v60  ;;  %v4478_v58 = vld [vmem:[#allocation19_spill] sm:$0xff] }
 0x139   :  { %vm3496_vm1 = vcmp.le.f32.partialorder %v4463_v52, 0.7853982  ;;  %v1617_v27 = vsel %vm1534_vm2, %v1616_v29, %v1615_v28  ;;  %v4467_v9 = vand.u32 2147483647, %v4459_v10  ;;  %v180_v26 = vxor.u32 2147483648, %v179_v40 }
 0x13a   :  { %v1308_v36 = vsel %vm3496_vm1, %v4460_v45, %v1305_v7  ;;  %vm202_vm4 = vcmp.lt.s32.totalorder %v4470_v57, 0  ;;  %vm2319_vm14 = vcmp.lt.s32.totalorder %v2318_v56, 0  ;;  %v393_v33 = vsel %vm3429_vm9, 0, %v391_v18 }
 0x13b   :  { %vm3514_vm3 = vcmp.le.f32.partialorder %v4467_v9, 0.7853982  ;;  %v495_v34 = vsel %vm410_vm8, %v494_v38, %v4462_v54  ;;  %2585 = vsinq.f32 %v1412_v60  ;;  %v4471_v2 = vand.u32 2147483647, %v4466_v55 }
 0x13c   :  { %v185_v30 = vsel %vm3514_vm3, 0, %v183_v46  ;;  %v271_v22 = vsel %vm2319_vm14, 0, %v2318_v56  ;;  %v1512_v31 = vxor.u32 2147483648, %v1511_v50  ;;  %v256_v42 = vadd.s32 %v3402_v51, %v3389_v63 }
 0x13d   :  { %vm3526_vm6 = vcmp.le.f32.partialorder %v4471_v2, 0.7853982  ;;  %v272_v53 = vsub.s32 32, %v271_v22  ;;  %v276_v12 = vsub.s32 4294967266, %v271_v22  ;;  %v2576_v19 = vpop.eup %2575  ;;  %2587 = vcosq.f32 %v1308_v36 }
 0x13e   :  { %v1620_v21 = vsel %vm3526_vm6, %v4466_v55, %v1617_v27  ;;  %v397_v28 = vadd.s32 3, %v393_v33  ;;  %v497_v37 = vsel %vm3438_vm11, 0, %v495_v34  ;;  %v181_v24 = vsel %vm98_vm13, %v180_v26, %v179_v40  ;;  %v2578_v6 = vpop.eup %2577  ;;  %v4482_v26 = vld [vmem:[#allocation17_spill] sm:$0xff] }
 0x13f   :  { %v4474_v43 = vand.u32 2147483647, %v4470_v57  ;;  %v273_v63 = vshll.u32 %v3473_v20, %v271_v22  ;;  %v274_v51 = vshrl.u32 %v256_v42, %v272_v53  ;;  %v277_v17 = vadd.s32 127, %v276_v12 }
 0x140   :  { %2589 = vsinq.f32 %v1308_v36  ;;  %vm1430_vm8 = vcmp.lt.s32.totalorder %v4477_v13, 0  ;;  %v189_v39 = vadd.s32 3, %v185_v30  ;;  %v286_v61 = vsub.s32 4, %v3449_v15  ;;  %v2580_v60 = vpop.eup %2579 }
 0x141   :  { %vm3543_vm7 = vcmp.le.f32.partialorder %v4474_v43, 0.7853982  ;;  %2591 = vcosq.f32 %v1620_v21  ;;  %v1513_v48 = vsel %vm1430_vm8, %v1512_v31, %v1511_v50  ;;  %v275_v0 = vor.u32 %v274_v51, %v273_v63  ;;  %v2582_v25 = vpop.eup %2581  ;;  %v4483_v63 = vld [vmem:[#allocation21_spill] sm:$0xff] }
 0x142   :  { %v278_v14 = vshll.u32 %v277_v17, 23  ;;  %v184_v20 = vsel %vm3514_vm3, %v4459_v10, %v181_v24  ;;  %v398_v7 = vand.u32 3, %v397_v28  ;;  %v501_v29 = vadd.s32 3, %v497_v37  ;;  %v3562_v50 = vpop.eup %2583 }
 0x143   :  { %v1306_v40 = vsub.s32 4, %v4478_v58  ;;  %2593 = vsinq.f32 %v1620_v21  ;;  %v4479_v54 = vand.u32 2147483647, %v4477_v13  ;;  %v401_v18 = vxor.u32 2147483648, %v2578_v6 }
 0x144   :  { %v279_v52 = vor.u32 4788187, %v278_v14  ;;  %v3567_v56 = vand.u32 3, %v189_v39  ;;  %v287_v36 = vsel %vm202_vm4, %v286_v61, %v3449_v15  ;;  %v404_v27 = vxor.u32 2147483648, %v2576_v19 }
 0x145   :  { %vm3558_vm9 = vcmp.le.f32.partialorder %v4479_v54, 0.7853982  ;;  %2595 = vcosq.f32 %v184_v20  ;;  %v282_v11 = vcvt.s32.f32 %v275_v0  ;;  %v1410_v33 = vsub.s32 4, %v4482_v26  ;;  %v3573_v34 = vpop.eup %2585 }
 0x146   :  { %v1516_v46 = vsel %vm3558_vm9, %v4477_v13, %v1513_v48  ;;  %v280_v9 = vand.u32 2147483647, %v279_v52  ;;  %2597 = vsinq.f32 %v184_v20  ;;  %vm400_vm10 = vcmp.eq.s32.totalorder %v398_v7, 0 }
 0x147   :  { %v502_v2 = vand.u32 3, %v501_v29  ;;  %v1307_v30 = vsel %vm1222_vm0, %v1306_v40, %v4478_v58  ;;  %v402_v31 = vsel %vm400_vm10, %v2576_v19, %v401_v18  ;;  %v505_v42 = vxor.u32 2147483648, %v2582_v25  ;;  %v3578_v15 = vpop.eup %2587 }
 0x148   :  { %v283_v22 = vmul.f32 %v282_v11, %v280_v9  ;;  %v508_v53 = vxor.u32 2147483648, %v2580_v60  ;;  %2599 = vcosq.f32 %v1516_v46  ;;  %v289_v12 = vsel %vm3543_vm7, 0, %v287_v36 }
 0x149   :  { %vm403_vm11 = vcmp.eq.s32.totalorder %v398_v7, 2  ;;  %v1514_v21 = vsub.s32 4, %v3350_v16  ;;  %2601 = vsinq.f32 %v1516_v46  ;;  %v1309_v37 = vsel %vm3496_vm1, 0, %v1307_v30 }
 0x14a   :  { %v284_v28 = vxor.u32 2147483648, %v283_v22  ;;  %v1411_v19 = vsel %vm1326_vm5, %v1410_v33, %v4482_v26  ;;  %v2590_v24 = vpop.eup %2589  ;;  %v405_v43 = vsel %vm403_vm11, %v404_v27, %v2578_v6  ;;  %vm504_vm13 = vcmp.eq.s32.totalorder %v502_v2, 0 }
 0x14b   :  { %vm507_vm0 = vcmp.eq.s32.totalorder %v502_v2, 2  ;;  %v1618_v51 = vsub.s32 4, %v4483_v63  ;;  %v3589_v17 = vpop.eup %2591  ;;  %v293_v61 = vadd.s32 3, %v289_v12  ;;  %v506_v48 = vsel %vm504_vm13, %v2580_v60, %v505_v42 }
 0x14c   :  { %v285_v39 = vsel %vm202_vm4, %v284_v28, %v283_v22  ;;  %v509_v0 = vsel %vm507_vm0, %v508_v53, %v2582_v25  ;;  %v1313_v14 = vadd.s32 3, %v1309_v37  ;;  %v1413_v6 = vsel %vm3453_vm12, 0, %v1411_v19 }
 0x14d   :  { %v288_v47 = vsel %vm3543_vm7, %v4470_v57, %v285_v39  ;;  %v1515_v20 = vsel %vm1430_vm8, %v1514_v21, %v3350_v16  ;;  %v3601_v29 = vpop.eup %2593  ;;  %vm399_vm5 = vcmp.lt.s32.totalorder %v398_v7, 2  ;;  %vm503_vm1 = vcmp.lt.s32.totalorder %v502_v2, 2 }
 0x14e   :  { %2603 = vcosq.f32 %v288_v47  ;;  %v406_v58 = vsel %vm399_vm5, %v402_v31, %v405_v43  ;;  %v1619_v41 = vsel %vm1534_vm2, %v1618_v51, %v4483_v63  ;;  %v294_v40 = vand.u32 3, %v293_v61 }
 0x14f   :  { %2605 = vsinq.f32 %v288_v47  ;;  %v2596_v60 = vpop.eup %2595  ;;  %v510_v25 = vsel %vm503_vm1, %v506_v48, %v509_v0  ;;  %v1417_v1 = vadd.s32 3, %v1413_v6  ;;  %v1517_v54 = vsel %vm3558_vm9, 0, %v1515_v20 }
 0x150   :  { %v2598_v52 = vpop.eup %2597  ;;  %vm192_vm12 = vcmp.eq.s32.totalorder %v3567_v56, 0  ;;  %vm396_vm3 = vweird.f32 %v2788_v35  ;;  %v1314_v16 = vand.u32 3, %v1313_v14  ;;  %vm191_vm4 = vcmp.lt.s32.totalorder %v3567_v56, 2 }
 0x151   :  { %vm195_vm14 = vcmp.eq.s32.totalorder %v3567_v56, 2  ;;  %vm500_vm7 = vweird.f32 %v4448_v4  ;;  %v1317_v7 = vxor.u32 2147483648, %v2590_v24  ;;  %v1621_v18 = vsel %vm3526_vm6, 0, %v1619_v41 }
 0x152   :  { %v2600_v46 = vpop.eup %2599  ;;  %v407_v36 = vsel %vm396_vm3, nan, %v406_v58  ;;  %v511_v38 = vsel %vm500_vm7, nan, %v510_v25  ;;  %v1320_v27 = vxor.u32 2147483648, %v3578_v15  ;;  %v1521_v9 = vadd.s32 3, %v1517_v54 }
 0x153   :  { %v2602_v11 = vpop.eup %2601  ;;  %v193_v26 = vxor.u32 2147483648, %v2598_v52  ;;  %v196_v35 = vxor.u32 2147483648, %v2596_v60  ;;  %vm295_vm2 = vcmp.lt.s32.totalorder %v294_v40, 2  ;;  %vm296_vm8 = vcmp.eq.s32.totalorder %v294_v40, 0 }
 0x154   :  { %v1418_v33 = vand.u32 3, %v1417_v1  ;;  %vm188_vm9 = vweird.f32 %v4459_v10  ;;  %vm292_vm10 = vweird.f32 %v4470_v57  ;;  %vm1316_vm11 = vcmp.eq.s32.totalorder %v1314_v16, 0 }
 0x155   :  { %v1421_v4 = vxor.u32 2147483648, %v3573_v34  ;;  %v1424_v44 = vxor.u32 2147483648, %v3562_v50  ;;  %v1625_v2 = vadd.s32 3, %v1621_v18  ;;  %vm299_vm6 = vcmp.eq.s32.totalorder %v294_v40, 2 }
 0x156   :  { %vm1315_vm13 = vcmp.lt.s32.totalorder %v1314_v16, 2  ;;  %v1318_v30 = vsel %vm1316_vm11, %v3578_v15, %v1317_v7  ;;  %vm1319_vm0 = vcmp.eq.s32.totalorder %v1314_v16, 2  ;;  %v1522_v31 = vand.u32 3, %v1521_v9  ;;  %v523_v7 = vpop.permute.xlu0 %522 }
 0x157   :  { %v1321_v22 = vsel %vm1319_vm0, %v1320_v27, %v2590_v24  ;;  %v1525_v42 = vxor.u32 2147483648, %v2602_v11  ;;  %v1528_v53 = vxor.u32 2147483648, %v2600_v46  ;;  %v194_v21 = vsel %vm192_vm12, %v2596_v60, %v193_v26 }
 0x158   :  { %v2604_v12 = vpop.eup %2603  ;;  %v197_v28 = vsel %vm195_vm14, %v196_v35, %v2598_v52  ;;  %vm1420_vm5 = vcmp.eq.s32.totalorder %v1418_v33, 0  ;;  %vm1423_vm1 = vcmp.eq.s32.totalorder %v1418_v33, 2  ;;  %v1626_v63 = vand.u32 3, %v1625_v2 }
 0x159   :  { %v2606_v37 = vpop.eup %2605  ;;  %v300_v19 = vxor.u32 2147483648, %v2604_v12  ;;  %v1422_v43 = vsel %vm1420_vm5, %v3562_v50, %v1421_v4  ;;  %v1425_v15 = vsel %vm1423_vm1, %v1424_v44, %v3573_v34  ;;  %v1322_v51 = vsel %vm1315_vm13, %v1318_v30, %v1321_v22 }
 0x15a   :  { %v297_v24 = vxor.u32 2147483648, %v2606_v37  ;;  %v1629_v39 = vxor.u32 2147483648, %v3601_v29  ;;  %v1632_v61 = vxor.u32 2147483648, %v3589_v17  ;;  %v198_v48 = vsel %vm191_vm4, %v194_v21, %v197_v28 }
 0x15b   :  { %v301_v0 = vsel %vm299_vm6, %v300_v19, %v2606_v37  ;;  %vm1419_vm12 = vcmp.lt.s32.totalorder %v1418_v33, 2  ;;  %vm1524_vm3 = vcmp.eq.s32.totalorder %v1522_v31, 0  ;;  %vm1527_vm14 = vcmp.eq.s32.totalorder %v1522_v31, 2 }
 0x15c   :  { %v298_v47 = vsel %vm296_vm8, %v2604_v12, %v297_v24  ;;  %v1426_v50 = vsel %vm1419_vm12, %v1422_v43, %v1425_v15  ;;  %v1526_v14 = vsel %vm1524_vm3, %v2600_v46, %v1525_v42  ;;  %v1529_v6 = vsel %vm1527_vm14, %v1528_v53, %v2602_v11  ;;  %v533_v12 = vpop.permute.xlu0 %532 }
 0x15d   :  { %v302_v34 = vsel %vm295_vm2, %v298_v47, %v301_v0  ;;  %vm1628_vm7 = vcmp.eq.s32.totalorder %v1626_v63, 0  ;;  %vm1631_vm11 = vcmp.eq.s32.totalorder %v1626_v63, 2  ;;  %v199_v20 = vsel %vm188_vm9, nan, %v198_v48 }
 0x15e   :  { %v303_v56 = vsel %vm292_vm10, nan, %v302_v34  ;;  %v1630_v58 = vsel %vm1628_vm7, %v3589_v17, %v1629_v39  ;;  %v1633_v41 = vsel %vm1631_vm11, %v1632_v61, %v3601_v29  ;;  %v2470_v25 = vpack.c.bf16 %v511_v38, %v407_v36 }
 0x15f   :  { %v2466_v60 = vpack.c.bf16 %v303_v56, %v199_v20  ;;  %vm1312_vm4 = vweird.f32 %v4460_v45  ;;  %vm1416_vm8 = vweird.f32 %v4455_v59  ;;  %vm1523_vm2 = vcmp.lt.s32.totalorder %v1522_v31, 2  ;;  %v513_v59 = vld [vmem:[%s4371_s2 + $0x8] sm:$0xff]  ;;  %v514_v45 = vld [vmem:[%s4371_s2 + $0x10] sm:$0xff] }
 0x160   :  { %v1323_v40 = vsel %vm1312_vm4, nan, %v1322_v51  ;;  %v1427_v1 = vsel %vm1416_vm8, nan, %v1426_v50  ;;  %vm1627_vm6 = vcmp.lt.s32.totalorder %v1626_v63, 2  ;;  %v1530_v10 = vsel %vm1523_vm2, %v1526_v14, %v1529_v6 }
 0x161   :  { %2467 = vmatprep.subr.bf16.mxu0 %v2466_v60  ;;  %v1634_v54 = vsel %vm1627_vm6, %v1630_v58, %v1633_v41  ;;  %v2482_v57 = vpack.c.bf16 %v1427_v1, %v1323_v40  ;;  %vm1520_vm9 = vweird.f32 %v4477_v13  ;;  %vm1624_vm10 = vweird.f32 %v4466_v55  ;;  %v515_v55 = vld [vmem:[%s4371_s2 + $0x18] sm:$0xff]  ;;  %v528_v13 = vpop.permute.xlu1 %527 }
 0x162   :  { %2469 = vmatpush3.bf16.msra.mxu0 %v2466_v60  ;;  %v1531_v17 = vsel %vm1520_vm9, nan, %v1530_v10  ;;  %v1635_v29 = vsel %vm1624_vm10, nan, %v1634_v54 }
 0x163   :  { %2471 = vmatprep.subr.bf16.mxu0 %v2470_v25  ;;  %v2486_v52 = vpack.c.bf16 %v1635_v29, %v1531_v17 }
 0x165   :  { %v538_v27 = vpop.permute.xlu1 %537 }
 0x166   :  { %2473 = vmatpush3.bf16.msra.mxu0 %v2470_v25 }
 0x167   :  { %2483 = vmatprep.subr.bf16.mxu0 %v2482_v57 }
 0x169   :  { %2425 = vmatmul.mubr.msk.f32.vlgmr.msra.gmra.mrb[0].mxu0 %vm540_vm15, %v513_v59 }
 0x16a   :  { %2427 = vmatprep.mubr.msk.f32.mxu0 %vm540_vm15, %v514_v45  ;;  %2485 = vmatpush3.bf16.msra.mxu0 %v2482_v57 }
 0x16b   :  { %2487 = vmatprep.subr.bf16.mxu0 %v2486_v52 }
 0x16d   :  { %2428 = vmatmul.mubr.msk.f32.gmra.mrb[2].mxu0 %vm540_vm15, %v515_v55 }
 0x16e   :  { %2489 = vmatpush3.bf16.msra.mxu0 %v2486_v52  ;;  %2449 = vmatprep.mubr.msk.f32.mxu0 %vm540_vm15, %v3469_v23 }
 0x171   :  { %2450 = vmatmul.mubr.msk.f32.vlgmr.msra.gmra.mrb[4].mxu0 %vm540_vm15, %v513_v59 }
 0x172   :  { %2452 = vmatprep.mubr.msk.f32.mxu0 %vm540_vm15, %v514_v45 }
 0x175   :  { %2453 = vmatmul.mubr.msk.f32.gmra.mrb[6].mxu0 %vm540_vm15, %v515_v55 }
 0x23c   :  { %v2426_v16 = vpop.f32.mrb[0].mxu0 }
 0x23d   :  { %v625_v18 = vadd.f32 %v2426_v16, %v528_v13  ;;  %v619_v46 = vpop.f32.mrb[1].mxu0 }
 0x23e   :  { %v620_v36 = vadd.f32 %v619_v46, %v523_v7 }
 0x23f   :  { %v3662_v38 = vmul.f32 30.0, %v625_v18 }
 0x240   :  { %v3664_v9 = vmul.f32 30.0, %v620_v36  ;;  %v2429_v11 = vpop.f32.mrb[2].mxu0 }
 0x241   :  { %v746_v23 = vand.u32 2147483647, %v3662_v38  ;;  %v749_v26 = vand.u32 2139095040, %v3662_v38  ;;  %v635_v35 = vadd.f32 %v2429_v11, %v538_v27  ;;  %v629_v33 = vpop.f32.mrb[3].mxu0 }
 0x242   :  { %v642_v4 = vand.u32 2147483647, %v3664_v9  ;;  %v645_v44 = vand.u32 2139095040, %v3664_v9  ;;  %v630_v15 = vadd.f32 %v629_v33, %v533_v12 }
 0x243   :  { %v750_v2 = vshrl.u32 %v749_v26, 23  ;;  %v753_v30 = vand.u32 8388607, %v746_v23  ;;  %v3672_v22 = vmul.f32 30.0, %v635_v35 }
 0x244   :  { %v646_v31 = vshrl.u32 %v645_v44, 23  ;;  %v649_v42 = vand.u32 8388607, %v642_v4  ;;  %v3676_v53 = vpop.f32.mrb[4].mxu0  ;;  %v3690_v34 = vmul.f32 30.0, %v630_v15 }
 0x245   :  { %v2336_v21 = vadd.s32 4294967169, %v750_v2  ;;  %v954_v28 = vand.u32 2147483647, %v3672_v22  ;;  %v3679_v37 = vpop.f32.mrb[5].mxu0  ;;  %v957_v43 = vand.u32 2139095040, %v3672_v22  ;;  %v754_v63 = vor.u32 8388608, %v753_v30 }
 0x246   :  { %v2332_v19 = vadd.s32 4294967169, %v646_v31  ;;  %v650_v51 = vor.u32 8388608, %v649_v42 }
 0x247   :  { %v756_v24 = vadd.s32 1, %v2336_v21  ;;  %v958_v61 = vshrl.u32 %v957_v43, 23  ;;  %v3684_v48 = vand.u32 8388607, %v954_v28  ;;  %v3692_v56 = vshll.u32 %v754_v63, 8 }
 0x248   :  { %v652_v39 = vadd.s32 1, %v2332_v19  ;;  %v3686_v0 = vpop.f32.mrb[6].mxu0  ;;  %v3696_v25 = vshll.u32 %v650_v51, 8 }
 0x249   :  { %vm757_vm13 = vcmp.gt.s32.totalorder %v756_v24, 0  ;;  %v3688_v47 = vpop.f32.mrb[7].mxu0  ;;  %v2344_v14 = vadd.s32 4294967169, %v958_v61  ;;  %v962_v40 = vor.u32 8388608, %v3684_v48 }
 0x24a   :  { %v758_v50 = vsel %vm757_vm13, %v756_v24, 0  ;;  %vm653_vm0 = vcmp.gt.s32.totalorder %v652_v39, 0 }
 0x24b   :  { %v759_v6 = vshrl.u32 %v758_v50, 5  ;;  %v760_v20 = vand.u32 31, %v758_v50  ;;  %v654_v58 = vsel %vm653_vm0, %v652_v39, 0  ;;  %v3701_v57 = vadd.s32 1, %v2344_v14 }
 0x24c   :  { %v3694_v41 = vshrl.u32 %v654_v58, 5  ;;  %v656_v60 = vand.u32 31, %v654_v58 }
 0x24d   :  { %v761_v1 = vsub.s32 32, %v760_v20  ;;  %v763_v10 = vshll.u32 %v4437_v49, %v760_v20  ;;  %v766_v54 = vshll.u32 %v4432_v8, %v760_v20  ;;  %v769_v17 = vshll.u32 %v4433_v32, %v760_v20 }
 0x24e   :  { %v772_v29 = vshll.u32 %v4441_v62, %v760_v20  ;;  %v775_v59 = vshll.u32 %v2692_v5, %v760_v20  ;;  %vm778_vm5 = vcmp.lt.s32.totalorder %v759_v6, 1  ;;  %vm779_vm1 = vcmp.lt.s32.totalorder %v759_v6, 2 }
 0x24f   :  { %v764_v45 = vshrl.u32 %v4432_v8, %v761_v1  ;;  %v767_v52 = vshrl.u32 %v4433_v32, %v761_v1  ;;  %v770_v55 = vshrl.u32 %v4441_v62, %v761_v1  ;;  %v762_v13 = vshrl.u32 %v4437_v49, %v761_v1 }
 0x250   :  { %v773_v16 = vshrl.u32 %v2692_v5, %v761_v1  ;;  %v776_v7 = vshrl.u32 %v4434_v3, %v761_v1  ;;  %vm780_vm12 = vcmp.lt.s32.totalorder %v759_v6, 3  ;;  %v657_v27 = vsub.s32 32, %v656_v60 }
 0x251   :  { %v765_v18 = vor.u32 %v764_v45, %v763_v10  ;;  %v768_v46 = vor.u32 %v767_v52, %v766_v54  ;;  %v771_v36 = vor.u32 %v770_v55, %v769_v17  ;;  %vm781_vm3 = vcmp.lt.s32.totalorder %v759_v6, 4 }
 0x252   :  { %v774_v11 = vor.u32 %v773_v16, %v772_v29  ;;  %v777_v26 = vor.u32 %v776_v7, %v775_v59  ;;  %v659_v35 = vshll.u32 %v4437_v49, %v656_v60  ;;  %v662_v21 = vshll.u32 %v4432_v8, %v656_v60 }
 0x253   :  { %v782_v33 = vsel %vm778_vm5, %v762_v13, %v765_v18  ;;  %v783_v44 = vsel %vm781_vm3, %v771_v36, 2102212464  ;;  %v786_v2 = vsel %vm778_vm5, %v765_v18, %v768_v46  ;;  %v790_v30 = vsel %vm778_vm5, %v768_v46, %v771_v36 }
 0x254   :  { %v784_v31 = vsel %vm780_vm12, %v768_v46, %v783_v44  ;;  %v787_v42 = vsel %vm781_vm3, %v774_v11, 920167782  ;;  %v791_v12 = vsel %vm781_vm3, %v777_v26, 1326507024  ;;  %v658_v15 = vshrl.u32 %v4437_v49, %v657_v27 }
 0x255   :  { %v788_v19 = vsel %vm780_vm12, %v771_v36, %v787_v42  ;;  %v792_v43 = vsel %vm780_vm12, %v774_v11, %v791_v12  ;;  %v660_v63 = vshrl.u32 %v4432_v8, %v657_v27  ;;  %v785_v24 = vsel %vm779_vm1, %v782_v33, %v784_v31 }
 0x256   :  { %v789_v51 = vsel %vm779_vm1, %v786_v2, %v788_v19  ;;  %v793_v39 = vsel %vm779_vm1, %v790_v30, %v792_v43  ;;  %v663_v61 = vshrl.u32 %v4433_v32, %v657_v27  ;;  %v665_v54 = vshll.u32 %v4433_v32, %v656_v60 }
 0x257   :  { %v3727_v50 = vmul.u32.u64.low %v3692_v56, %v793_v39  ;;  %v3728_v14 = vmul.u32.u64.high %v3692_v56, %v793_v39, %v3727_v50  ;;  %v3731_v20 = vmul.u32.u64.low %v3692_v56, %v789_v51  ;;  %v3732_v58 = vmul.u32.u64.high %v3692_v56, %v789_v51, %v3731_v20 }
 0x258   :  { %v661_v1 = vor.u32 %v660_v63, %v659_v35  ;;  %v664_v10 = vor.u32 %v663_v61, %v662_v21  ;;  %v666_v17 = vshrl.u32 %v4441_v62, %v657_v27  ;;  %v801_v6 = vmul.u32 %v3692_v56, %v785_v24 }
 0x259   :  { %v668_v29 = vshll.u32 %v4441_v62, %v656_v60  ;;  %v669_v59 = vshrl.u32 %v2692_v5, %v657_v27  ;;  %v672_v45 = vshrl.u32 %v4434_v3, %v657_v27  ;;  %v671_v55 = vshll.u32 %v2692_v5, %v656_v60 }
 0x25a   :  { %v667_v52 = vor.u32 %v666_v17, %v665_v54  ;;  %vm674_vm14 = vcmp.lt.s32.totalorder %v3694_v41, 1  ;;  %vm675_vm7 = vcmp.lt.s32.totalorder %v3694_v41, 2  ;;  %vm803_vm11 = vc.u32 %v3728_v14, %v3731_v20 }
 0x25b   :  { %v804_v13 = vadd.s32 1, %v3732_v58  ;;  %v670_v16 = vor.u32 %v669_v59, %v668_v29  ;;  %vm676_vm4 = vcmp.lt.s32.totalorder %v3694_v41, 3  ;;  %v673_v56 = vor.u32 %v672_v45, %v671_v55 }
 0x25c   :  { %vm677_vm8 = vcmp.lt.s32.totalorder %v3694_v41, 4  ;;  %v678_v7 = vsel %vm674_vm14, %v658_v15, %v661_v1  ;;  %v682_v18 = vsel %vm674_vm14, %v661_v1, %v664_v10  ;;  %v686_v27 = vsel %vm674_vm14, %v664_v10, %v667_v52 }
 0x25d   :  { %v805_v46 = vsel %vm803_vm11, %v804_v13, %v3732_v58  ;;  %v679_v60 = vsel %vm677_vm8, %v667_v52, 2102212464  ;;  %v683_v36 = vsel %vm677_vm8, %v670_v16, 920167782  ;;  %v687_v33 = vsel %vm677_vm8, %v673_v56, 1326507024 }
 0x25e   :  { %v806_v11 = vadd.s32 %v805_v46, %v801_v6  ;;  %v680_v26 = vsel %vm676_vm4, %v664_v10, %v679_v60  ;;  %v684_v35 = vsel %vm676_vm4, %v667_v52, %v683_v36  ;;  %v688_v2 = vsel %vm676_vm4, %v670_v16, %v687_v33 }
 0x25f   :  { %v685_v44 = vsel %vm675_vm7, %v682_v18, %v684_v35  ;;  %vm965_vm2 = vcmp.gt.s32.totalorder %v3701_v57, 0  ;;  %v853_v30 = vand.u32 2139095040, %v3690_v34  ;;  %v689_v42 = vsel %vm675_vm7, %v686_v27, %v688_v2 }
 0x260   :  { %v807_v31 = vadd.s32 536870912, %v806_v11  ;;  %v3757_v12 = vmul.u32.u64.low %v3696_v25, %v685_v44  ;;  %v3758_v21 = vmul.u32.u64.high %v3696_v25, %v685_v44, %v3757_v12  ;;  %v681_v19 = vsel %vm675_vm7, %v678_v7, %v680_v26 }
 0x261   :  { %v3764_v43 = vmul.u32.u64.low %v3696_v25, %v689_v42  ;;  %v3765_v15 = vmul.u32.u64.high %v3696_v25, %v689_v42, %v3764_v43  ;;  %v966_v63 = vsel %vm965_vm2, %v3701_v57, 0  ;;  %v3772_v39 = vshll.u32 %v962_v40, 8 }
 0x262   :  { %v3768_v24 = vshrl.u32 %v807_v31, 30  ;;  %v968_v51 = vand.u32 31, %v966_v63  ;;  %v850_v61 = vand.u32 2147483647, %v3690_v34  ;;  %v854_v50 = vshrl.u32 %v853_v30, 23 }
 0x263   :  { %v697_v41 = vmul.u32 %v3696_v25, %v681_v19  ;;  %v700_v1 = vadd.s32 1, %v3758_v21  ;;  %vm699_vm6 = vc.u32 %v3765_v15, %v3757_v12  ;;  %v967_v57 = vshrl.u32 %v966_v63, 5 }
 0x264   :  { %v809_v58 = vshll.u32 %v3768_v24, 30  ;;  %v969_v10 = vsub.s32 32, %v968_v51  ;;  %v971_v54 = vshll.u32 %v4437_v49, %v968_v51  ;;  %v974_v48 = vshll.u32 %v4432_v8, %v968_v51 }
 0x265   :  { %v701_v17 = vsel %vm699_vm6, %v700_v1, %v3758_v21  ;;  %v977_v29 = vshll.u32 %v4433_v32, %v968_v51  ;;  %v980_v52 = vshll.u32 %v4441_v62, %v968_v51  ;;  %v983_v56 = vshll.u32 %v2692_v5, %v968_v51 }
 0x266   :  { %v3782_v40 = vsub.s32 %v806_v11, %v809_v58  ;;  %v972_v6 = vshrl.u32 %v4432_v8, %v969_v10  ;;  %v702_v25 = vadd.s32 %v701_v17, %v697_v41  ;;  %v975_v59 = vshrl.u32 %v4433_v32, %v969_v10  ;;  %v1652_v17 = vpop.permute.xlu1 %1651 }
 0x267   :  { %v978_v45 = vshrl.u32 %v4441_v62, %v969_v10  ;;  %v981_v16 = vshrl.u32 %v2692_v5, %v969_v10  ;;  %v984_v60 = vshrl.u32 %v4434_v3, %v969_v10  ;;  %v970_v27 = vshrl.u32 %v4437_v49, %v969_v10 }
 0x268   :  { %v812_v55 = vsub.s32 0, %v3782_v40  ;;  %v973_v13 = vor.u32 %v972_v6, %v971_v54  ;;  %v703_v7 = vadd.s32 536870912, %v702_v25  ;;  %v976_v18 = vor.u32 %v975_v59, %v974_v48 }
 0x269   :  { %v979_v46 = vor.u32 %v978_v45, %v977_v29  ;;  %v982_v11 = vor.u32 %v981_v16, %v980_v52  ;;  %v2340_v26 = vadd.s32 4294967169, %v854_v50  ;;  %v985_v33 = vor.u32 %v984_v60, %v983_v56 }
 0x26a   :  { %v2337_v36 = vmin.u32 %v812_v55, %v3782_v40  ;;  %v3796_v35 = vshrl.u32 %v703_v7, 30  ;;  %vm986_vm9 = vcmp.lt.s32.totalorder %v967_v57, 1  ;;  %vm989_vm10 = vcmp.lt.s32.totalorder %v967_v57, 4 }
 0x26b   :  { %vm987_vm13 = vcmp.lt.s32.totalorder %v967_v57, 2  ;;  %v991_v2 = vsel %vm989_vm10, %v979_v46, 2102212464  ;;  %v994_v30 = vsel %vm986_vm9, %v973_v13, %v976_v18  ;;  %vm988_vm0 = vcmp.lt.s32.totalorder %v967_v57, 3 }
 0x26c   :  { %v814_v44 = vclz %v2337_v36  ;;  %v705_v31 = vshll.u32 %v3796_v35, 30  ;;  %v995_v42 = vsel %vm989_vm10, %v982_v11, 920167782  ;;  %v998_v21 = vsel %vm986_vm9, %v976_v18, %v979_v46  ;;  %v1647_v36 = vpop.permute.xlu0 %1646 }
 0x26d   :  { %v990_v43 = vsel %vm986_vm9, %v970_v27, %v973_v13  ;;  %v996_v63 = vsel %vm988_vm0, %v979_v46, %v995_v42  ;;  %v999_v51 = vsel %vm989_vm10, %v985_v33, 1326507024  ;;  %v992_v50 = vsel %vm988_vm0, %v976_v18, %v991_v2 }
 0x26e   :  { %v2338_v19 = vadd.s32 4294967294, %v814_v44  ;;  %v3799_v58 = vsub.s32 %v702_v25, %v705_v31  ;;  %v997_v41 = vsel %vm987_vm13, %v994_v30, %v996_v63  ;;  %v1000_v1 = vsel %vm988_vm0, %v982_v11, %v999_v51  ;;  %v1662_v44 = vpop.permute.xlu1 %1661 }
 0x26f   :  { %v1001_v10 = vsel %vm987_vm13, %v998_v21, %v1000_v1  ;;  %v3804_v54 = vmul.u32.u64.low %v3772_v39, %v997_v41  ;;  %v3805_v48 = vmul.u32.u64.high %v3772_v39, %v997_v41, %v3804_v54  ;;  %v993_v52 = vsel %vm987_vm13, %v990_v43, %v992_v50 }
 0x270   :  { %vm2339_vm5 = vcmp.lt.s32.totalorder %v2338_v19, 0  ;;  %v708_v29 = vsub.s32 0, %v3799_v58  ;;  %v3809_v59 = vmul.u32.u64.low %v3772_v39, %v1001_v10  ;;  %v3810_v45 = vmul.u32.u64.high %v3772_v39, %v1001_v10, %v3809_v59 }
 0x271   :  { %v817_v6 = vsel %vm2339_vm5, 0, %v2338_v19  ;;  %v857_v55 = vand.u32 8388607, %v850_v61  ;;  %v860_v13 = vadd.s32 1, %v2340_v26  ;;  %v802_v56 = vadd.s32 %v3731_v20, %v3728_v14 }
 0x272   :  { %v822_v25 = vsub.s32 4294967266, %v817_v6  ;;  %v2333_v16 = vmin.u32 %v708_v29, %v3799_v58  ;;  %v818_v7 = vsub.s32 32, %v817_v6  ;;  %v1012_v18 = vadd.s32 1, %v3805_v48 }
 0x273   :  { %vm861_vm1 = vcmp.gt.s32.totalorder %v860_v13, 0  ;;  %v1009_v60 = vmul.u32 %v3772_v39, %v993_v52  ;;  %vm1011_vm12 = vc.u32 %v3810_v45, %v3804_v54  ;;  %v858_v26 = vor.u32 8388608, %v857_v55 }
 0x274   :  { %v710_v46 = vclz %v2333_v16  ;;  %v862_v57 = vsel %vm861_vm1, %v860_v13, 0  ;;  %v823_v27 = vadd.s32 127, %v822_v25  ;;  %v1013_v11 = vsel %vm1011_vm12, %v1012_v18, %v3805_v48 }
 0x275   :  { %v1748_v33 = vadd.f32 %v3676_v53, %v1652_v17  ;;  %v1014_v14 = vadd.s32 %v1013_v11, %v1009_v60  ;;  %v864_v20 = vand.u32 31, %v862_v57  ;;  %v1743_v30 = vadd.f32 %v3679_v37, %v1647_v36 }
 0x276   :  { %v2334_v2 = vadd.s32 4294967294, %v710_v46  ;;  %v820_v31 = vshrl.u32 %v802_v56, %v818_v7  ;;  %v3825_v42 = vadd.f32 %v3686_v0, %v1662_v44  ;;  %v698_v39 = vadd.s32 %v3757_v12, %v3765_v15 }
 0x277   :  { %v1015_v21 = vadd.s32 536870912, %v1014_v14  ;;  %v865_v19 = vsub.s32 32, %v864_v20  ;;  %v819_v43 = vshll.u32 %v3782_v40, %v817_v6  ;;  %v824_v63 = vshll.u32 %v823_v27, 23 }
 0x278   :  { %vm2335_vm3 = vcmp.lt.s32.totalorder %v2334_v2, 0  ;;  %v3830_v53 = vshll.u32 %v858_v26, 8  ;;  %v3832_v51 = vmul.f32 30.0, %v1748_v33  ;;  %v3837_v37 = vadd.s32 %v3804_v54, %v3810_v45 }
 0x279   :  { %v3834_v50 = vsel %vm2335_vm3, 0, %v2334_v2  ;;  %v3839_v0 = vshrl.u32 %v1015_v21, 30  ;;  %v3841_v41 = vmul.f32 30.0, %v1743_v30  ;;  %v821_v12 = vor.u32 %v820_v31, %v819_v43 }
 0x27a   :  { %v863_v15 = vshrl.u32 %v862_v57, 5  ;;  %v868_v1 = vshrl.u32 %v4432_v8, %v865_v19  ;;  %v871_v40 = vshrl.u32 %v4433_v32, %v865_v19  ;;  %v867_v48 = vshll.u32 %v4437_v49, %v864_v20 }
 0x27b   :  { %v1017_v10 = vshll.u32 %v3839_v0, 30  ;;  %v870_v17 = vshll.u32 %v4432_v8, %v864_v20  ;;  %v874_v6 = vshrl.u32 %v4441_v62, %v865_v19  ;;  %v825_v54 = vor.u32 4788187, %v824_v63 }
 0x27c   :  { %v718_v29 = vsub.s32 4294967266, %v3834_v50  ;;  %v873_v59 = vshll.u32 %v4433_v32, %v864_v20  ;;  %v1869_v45 = vand.u32 2147483647, %v3832_v51  ;;  %v869_v52 = vor.u32 %v868_v1, %v867_v48 }
 0x27d   :  { %v3852_v25 = vsub.s32 %v1014_v14, %v1017_v10  ;;  %v872_v55 = vor.u32 %v871_v40, %v870_v17  ;;  %v876_v13 = vshll.u32 %v4441_v62, %v864_v20  ;;  %v877_v56 = vshrl.u32 %v2692_v5, %v865_v19 }
 0x27e   :  { %v875_v16 = vor.u32 %v874_v6, %v873_v59  ;;  %v879_v7 = vshll.u32 %v2692_v5, %v864_v20  ;;  %v880_v18 = vshrl.u32 %v4434_v3, %v865_v19  ;;  %v828_v46 = vcvt.s32.f32 %v821_v12 }
 0x27f   :  { %v1020_v60 = vsub.s32 0, %v3852_v25  ;;  %vm882_vm14 = vcmp.lt.s32.totalorder %v863_v15, 1  ;;  %vm883_vm7 = vcmp.lt.s32.totalorder %v863_v15, 2  ;;  %v714_v57 = vsub.s32 32, %v3834_v50 }
 0x280   :  { %v719_v36 = vadd.s32 127, %v718_v29  ;;  %v878_v27 = vor.u32 %v877_v56, %v876_v13  ;;  %v881_v11 = vor.u32 %v880_v18, %v879_v7  ;;  %vm884_vm11 = vcmp.lt.s32.totalorder %v863_v15, 3 }
 0x281   :  { %v2345_v26 = vmin.u32 %v1020_v60, %v3852_v25  ;;  %vm885_vm4 = vcmp.lt.s32.totalorder %v863_v15, 4  ;;  %v890_v33 = vsel %vm882_vm14, %v869_v52, %v872_v55  ;;  %v894_v14 = vsel %vm882_vm14, %v872_v55, %v875_v16 }
 0x282   :  { %v887_v44 = vsel %vm885_vm4, %v875_v16, 2102212464  ;;  %v891_v2 = vsel %vm885_vm4, %v878_v27, 920167782  ;;  %v895_v20 = vsel %vm885_vm4, %v881_v11, 1326507024  ;;  %v866_v21 = vshrl.u32 %v4437_v49, %v865_v19 }
 0x283   :  { %v826_v30 = vand.u32 2147483647, %v825_v54  ;;  %v1022_v31 = vclz %v2345_v26  ;;  %v892_v43 = vsel %vm884_vm11, %v875_v16, %v891_v2  ;;  %v716_v63 = vshrl.u32 %v698_v39, %v714_v57 }
 0x284   :  { %v720_v12 = vshll.u32 %v719_v36, 23  ;;  %v893_v1 = vsel %vm883_vm7, %v890_v33, %v892_v43  ;;  %v896_v40 = vsel %vm884_vm11, %v878_v27, %v895_v20  ;;  %v886_v48 = vsel %vm882_vm14, %v866_v21, %v869_v52  ;;  %v3895_v33 = vld [vmem:[%s4373_s4] sm:$0xff] }
 0x285   :  { %v2346_v10 = vadd.s32 4294967294, %v1022_v31  ;;  %v888_v17 = vsel %vm884_vm11, %v872_v55, %v887_v44  ;;  %v897_v6 = vsel %vm883_vm7, %v894_v14, %v896_v40  ;;  %v3878_v39 = vmul.f32 %v828_v46, %v826_v30  ;;  %2438 = vmatprep.mubr.msk.f32.mxu1 %vm540_vm15, %v3895_v33 }
 0x286   :  { %v3871_v54 = vmul.u32.u64.low %v3830_v53, %v897_v6  ;;  %v3872_v29 = vmul.u32.u64.high %v3830_v53, %v897_v6, %v3871_v54  ;;  %v3875_v19 = vmul.u32.u64.low %v3830_v53, %v893_v1  ;;  %v3876_v59 = vmul.u32.u64.high %v3830_v53, %v893_v1, %v3875_v19 }
 0x287   :  { %v715_v13 = vshll.u32 %v3799_v58, %v3834_v50  ;;  %vm2347_vm8 = vcmp.lt.s32.totalorder %v2346_v10, 0  ;;  %v1872_v52 = vand.u32 2139095040, %v3832_v51  ;;  %v721_v16 = vor.u32 4788187, %v720_v12 }
 0x288   :  { %v1025_v55 = vsel %vm2347_vm8, 0, %v2346_v10  ;;  %v889_v56 = vsel %vm883_vm7, %v886_v48, %v888_v17  ;;  %v1768_v7 = vand.u32 2139095040, %v3841_v41  ;;  %vm907_vm2 = vc.u32 %v3872_v29, %v3875_v19 }
 0x289   :  { %v717_v18 = vor.u32 %v716_v63, %v715_v13  ;;  %v1026_v60 = vsub.s32 32, %v1025_v55  ;;  %v1030_v57 = vsub.s32 4294967266, %v1025_v55  ;;  %v1873_v36 = vshrl.u32 %v1872_v52, 23  ;;  %v1657_v52 = vpop.permute.xlu0 %1656 }
 0x28a   :  { %v908_v46 = vadd.s32 1, %v3876_v59  ;;  %v1876_v58 = vand.u32 8388607, %v1869_v45  ;;  %v1765_v50 = vand.u32 2147483647, %v3841_v41  ;;  %v905_v15 = vmul.u32 %v3830_v53, %v889_v56 }
 0x28b   :  { %v1028_v27 = vshrl.u32 %v3837_v37, %v1026_v60  ;;  %v1031_v11 = vadd.s32 127, %v1030_v57  ;;  %v2374_v26 = vadd.s32 4294967169, %v1873_v36  ;;  %v722_v44 = vand.u32 2147483647, %v721_v16 }
 0x28c   :  { %v1027_v2 = vshll.u32 %v3852_v25, %v1025_v55  ;;  %v909_v14 = vsel %vm907_vm2, %v908_v46, %v3876_v59  ;;  %v1769_v20 = vshrl.u32 %v1768_v7, 23  ;;  %v724_v30 = vcvt.s32.f32 %v717_v18 }
 0x28d   :  { %v1032_v37 = vshll.u32 %v1031_v11, 23  ;;  %v910_v31 = vadd.s32 %v909_v14, %v905_v15  ;;  %v1879_v21 = vadd.s32 1, %v2374_v26  ;;  %v1877_v43 = vor.u32 8388608, %v1876_v58 }
 0x28e   :  { %v1029_v53 = vor.u32 %v1028_v27, %v1027_v2  ;;  %v2370_v63 = vadd.s32 4294967169, %v1769_v20  ;;  %v3903_v12 = vand.u32 8388607, %v1765_v50  ;;  %v830_v25 = vxor.u32 2147483648, %v3878_v39 }
 0x28f   :  { %v1033_v1 = vor.u32 4788187, %v1032_v37  ;;  %v911_v40 = vadd.s32 536870912, %v910_v31  ;;  %vm1880_vm6 = vcmp.gt.s32.totalorder %v1879_v21, 0  ;;  %v3906_v10 = vmul.f32 %v724_v30, %v722_v44 }
 0x290   :  { %v1881_v48 = vsel %vm1880_vm6, %v1879_v21, 0  ;;  %v1775_v17 = vadd.s32 1, %v2370_v63  ;;  %v3909_v54 = vadd.s32 %v3875_v19, %v3872_v29  ;;  %v1036_v16 = vcvt.s32.f32 %v1029_v53 }
 0x291   :  { %v1034_v6 = vand.u32 2147483647, %v1033_v1  ;;  %v3911_v59 = vshrl.u32 %v911_v40, 30  ;;  %v1883_v13 = vand.u32 31, %v1881_v48  ;;  %v3913_v55 = vshll.u32 %v1877_v43, 8 }
 0x292   :  { %v1773_v56 = vor.u32 8388608, %v3903_v12  ;;  %v3917_v7 = vmul.f32 30.0, %v3825_v42  ;;  %v1882_v60 = vshrl.u32 %v1881_v48, 5  ;;  %v3921_v36 = vadd.f32 %v3688_v47, %v1657_v52 }
 0x293   :  { %v913_v18 = vshll.u32 %v3911_v59, 30  ;;  %v1884_v57 = vsub.s32 32, %v1883_v13  ;;  %v1037_v29 = vmul.f32 %v1036_v16, %v1034_v6  ;;  %v1886_v19 = vshll.u32 %v4437_v49, %v1883_v13 }
 0x294   :  { %v1889_v46 = vshll.u32 %v4432_v8, %v1883_v13  ;;  %vm1776_vm9 = vcmp.gt.s32.totalorder %v1775_v17, 0  ;;  %v1892_v42 = vshll.u32 %v4433_v32, %v1883_v13  ;;  %v1895_v11 = vshll.u32 %v4441_v62, %v1883_v13 }
 0x295   :  { %v3925_v58 = vsub.s32 %v910_v31, %v913_v18  ;;  %v1887_v27 = vshrl.u32 %v4432_v8, %v1884_v57  ;;  %v1890_v15 = vshrl.u32 %v4433_v32, %v1884_v57  ;;  %v1893_v26 = vshrl.u32 %v4441_v62, %v1884_v57 }
 0x296   :  { %v1896_v47 = vshrl.u32 %v2692_v5, %v1884_v57  ;;  %v1899_v44 = vshrl.u32 %v4434_v3, %v1884_v57  ;;  %vm956_vm10 = vcmp.lt.s32.totalorder %v3672_v22, 0  ;;  %v1898_v20 = vshll.u32 %v2692_v5, %v1883_v13 }
 0x297   :  { %v916_v2 = vsub.s32 0, %v3925_v58  ;;  %v1888_v14 = vor.u32 %v1887_v27, %v1886_v19  ;;  %v2080_v30 = vand.u32 2139095040, %v3917_v7  ;;  %v1885_v37 = vshrl.u32 %v4437_v49, %v1884_v57 }
 0x298   :  { %v1891_v31 = vor.u32 %v1890_v15, %v1889_v46  ;;  %v1894_v21 = vor.u32 %v1893_v26, %v1892_v42  ;;  %v1897_v53 = vor.u32 %v1896_v47, %v1895_v11  ;;  %v1038_v43 = vxor.u32 2147483648, %v1037_v29 }
 0x299   :  { %v2341_v63 = vmin.u32 %v916_v2, %v3925_v58  ;;  %v1900_v1 = vor.u32 %v1899_v44, %v1898_v20  ;;  %vm1901_vm13 = vcmp.lt.s32.totalorder %v1882_v60, 1  ;;  %vm1902_vm0 = vcmp.lt.s32.totalorder %v1882_v60, 2 }
 0x29a   :  { %vm1903_vm5 = vcmp.lt.s32.totalorder %v1882_v60, 3  ;;  %vm1904_vm1 = vcmp.lt.s32.totalorder %v1882_v60, 4  ;;  %v1905_v40 = vsel %vm1901_vm13, %v1885_v37, %v1888_v14  ;;  %v1909_v52 = vsel %vm1901_vm13, %v1888_v14, %v1891_v31 }
 0x29b   :  { %v918_v48 = vclz %v2341_v63  ;;  %v1906_v6 = vsel %vm1904_vm1, %v1894_v21, 2102212464  ;;  %v1910_v13 = vsel %vm1904_vm1, %v1897_v53, 920167782  ;;  %v1913_v19 = vsel %vm1901_vm13, %v1891_v31, %v1894_v21 }
 0x29c   :  { %v1907_v16 = vsel %vm1903_vm5, %v1891_v31, %v1906_v6  ;;  %v1911_v18 = vsel %vm1903_vm5, %v1894_v21, %v1910_v13  ;;  %v1914_v57 = vsel %vm1904_vm1, %v1900_v1, 1326507024  ;;  %v2077_v44 = vand.u32 2147483647, %v3917_v7 }
 0x29d   :  { %v2342_v46 = vadd.s32 4294967294, %v918_v48  ;;  %v1908_v27 = vsel %vm1902_vm0, %v1905_v40, %v1907_v16  ;;  %v1912_v42 = vsel %vm1902_vm0, %v1909_v52, %v1911_v18  ;;  %v1915_v11 = vsel %vm1903_vm5, %v1897_v53, %v1914_v57 }
 0x29e   :  { %v1916_v15 = vsel %vm1902_vm0, %v1913_v19, %v1915_v11  ;;  %v3944_v26 = vmul.u32.u64.low %v3913_v55, %v1912_v42  ;;  %v3945_v47 = vmul.u32.u64.high %v3913_v55, %v1912_v42, %v3944_v26  ;;  %v1777_v20 = vsel %vm1776_vm9, %v1775_v17, 0 }
 0x29f   :  { %vm2343_vm12 = vcmp.lt.s32.totalorder %v2342_v46, 0  ;;  %v3950_v2 = vmul.u32.u64.low %v3913_v55, %v1916_v15  ;;  %v3951_v14 = vmul.u32.u64.high %v3913_v55, %v1916_v15, %v3950_v2  ;;  %v3956_v37 = vsel %vm956_vm10, %v1038_v43, %v1037_v29 }
 0x2a0   :  { %v921_v60 = vsel %vm2343_vm12, 0, %v2342_v46  ;;  %v1924_v31 = vmul.u32 %v3913_v55, %v1908_v27  ;;  %v1779_v21 = vand.u32 31, %v1777_v20  ;;  %v1778_v1 = vshrl.u32 %v1777_v20, 5 }
 0x2a1   :  { %v922_v53 = vsub.s32 32, %v921_v60  ;;  %v926_v63 = vsub.s32 4294967266, %v921_v60  ;;  %v2081_v40 = vshrl.u32 %v2080_v30, 23  ;;  %v923_v48 = vshll.u32 %v3925_v58, %v921_v60 }
 0x2a2   :  { %v1927_v6 = vadd.s32 1, %v3945_v47  ;;  %v1780_v52 = vsub.s32 32, %v1779_v21  ;;  %v3963_v17 = vand.u32 8388607, %v2077_v44  ;;  %vm1926_vm3 = vc.u32 %v3951_v14, %v3944_v26 }
 0x2a3   :  { %v924_v29 = vshrl.u32 %v3909_v54, %v922_v53  ;;  %v927_v43 = vadd.s32 127, %v926_v63  ;;  %v1782_v55 = vshll.u32 %v4437_v49, %v1779_v21  ;;  %v1785_v58 = vshll.u32 %v4432_v8, %v1779_v21 }
 0x2a4   :  { %v1928_v13 = vsel %vm1926_vm3, %v1927_v6, %v3945_v47  ;;  %v1783_v30 = vshrl.u32 %v4432_v8, %v1780_v52  ;;  %v1786_v16 = vshrl.u32 %v4433_v32, %v1780_v52  ;;  %v1781_v46 = vshrl.u32 %v4437_v49, %v1780_v52 }
 0x2a5   :  { %v925_v18 = vor.u32 %v924_v29, %v923_v48  ;;  %v928_v19 = vshll.u32 %v927_v43, 23  ;;  %v1929_v57 = vadd.s32 %v1928_v13, %v1924_v31  ;;  %vm3976_vm14 = vcmp.le.f32.partialorder %v954_v28, 0.7853982 }
 0x2a6   :  { %v1784_v27 = vor.u32 %v1783_v30, %v1782_v55  ;;  %v1787_v42 = vor.u32 %v1786_v16, %v1785_v58  ;;  %v1788_v11 = vshll.u32 %v4433_v32, %v1779_v21  ;;  %v1789_v15 = vshrl.u32 %v4441_v62, %v1780_v52 }
 0x2a7   :  { %vm852_vm7 = vcmp.lt.s32.totalorder %v3690_v34, 0  ;;  %v929_v47 = vor.u32 4788187, %v928_v19  ;;  %v1930_v2 = vadd.s32 536870912, %v1929_v57  ;;  %v1791_v20 = vshll.u32 %v4441_v62, %v1779_v21 }
 0x2a8   :  { %v1792_v60 = vshrl.u32 %v2692_v5, %v1780_v52  ;;  %v932_v31 = vcvt.s32.f32 %v925_v18  ;;  %v1790_v53 = vor.u32 %v1789_v15, %v1788_v11  ;;  %v1794_v28 = vshll.u32 %v2692_v5, %v1779_v21 }
 0x2a9   :  { %v1795_v63 = vshrl.u32 %v4434_v3, %v1780_v52  ;;  %vm748_vm11 = vcmp.lt.s32.totalorder %v3662_v38, 0  ;;  %v930_v48 = vand.u32 2147483647, %v929_v47  ;;  %v3988_v6 = vshrl.u32 %v1930_v2, 30 }
 0x2aa   :  { %v1793_v29 = vor.u32 %v1792_v60, %v1791_v20  ;;  %vm1797_vm4 = vcmp.lt.s32.totalorder %v1778_v1, 1  ;;  %vm1799_vm8 = vcmp.lt.s32.totalorder %v1778_v1, 3  ;;  %vm1800_vm2 = vcmp.lt.s32.totalorder %v1778_v1, 4 }
 0x2ab   :  { %v1796_v43 = vor.u32 %v1795_v63, %v1794_v28  ;;  %v1801_v55 = vsel %vm1797_vm4, %v1781_v46, %v1784_v27  ;;  %v933_v13 = vmul.f32 %v932_v31, %v930_v48  ;;  %v1932_v30 = vshll.u32 %v3988_v6, 30 }
 0x2ac   :  { %v1802_v58 = vsel %vm1800_vm2, %v1790_v53, 2102212464  ;;  %v1805_v16 = vsel %vm1797_vm4, %v1784_v27, %v1787_v42  ;;  %v1806_v18 = vsel %vm1800_vm2, %v1793_v29, 920167782  ;;  %v1809_v52 = vsel %vm1797_vm4, %v1787_v42, %v1790_v53 }
 0x2ad   :  { %v1803_v21 = vsel %vm1799_vm8, %v1787_v42, %v1802_v58  ;;  %v1810_v19 = vsel %vm1800_vm2, %v1796_v43, 1326507024  ;;  %v934_v11 = vxor.u32 2147483648, %v933_v13  ;;  %v3992_v15 = vsub.s32 %v1929_v57, %v1932_v30 }
 0x2ae   :  { %vm1798_vm6 = vcmp.lt.s32.totalorder %v1778_v1, 2  ;;  %v1807_v47 = vsel %vm1799_vm8, %v1790_v53, %v1806_v18  ;;  %v1811_v20 = vsel %vm1799_vm8, %v1793_v29, %v1810_v19  ;;  %v1813_v46 = vshll.u32 %v1773_v56, 8 }
 0x2af   :  { %v1808_v2 = vsel %vm1798_vm6, %v1805_v16, %v1807_v47  ;;  %v2382_v60 = vadd.s32 4294967169, %v2081_v40  ;;  %v4002_v27 = vsel %vm3976_vm14, %v3672_v22, %v3956_v37  ;;  %v1935_v42 = vsub.s32 0, %v3992_v15 }
 0x2b0   :  { %v1804_v57 = vsel %vm1798_vm6, %v1801_v55, %v1803_v21  ;;  %v1812_v31 = vsel %vm1798_vm6, %v1809_v52, %v1811_v20  ;;  %v935_v53 = vsel %vm852_vm7, %v934_v11, %v933_v13  ;;  %v2085_v37 = vor.u32 8388608, %v3963_v17 }
 0x2b1   :  { %v4007_v28 = vmul.u32.u64.low %v1813_v46, %v1812_v31  ;;  %v4008_v1 = vmul.u32.u64.high %v1813_v46, %v1812_v31, %v4007_v28  ;;  %v2087_v63 = vadd.s32 1, %v2382_v60  ;;  %v2375_v12 = vmin.u32 %v1935_v42, %v3992_v15 }
 0x2b2   :  { %v4011_v56 = vmul.u32.u64.low %v1813_v46, %v1808_v2  ;;  %v4012_v40 = vmul.u32.u64.high %v1813_v46, %v1808_v2, %v4011_v56  ;;  %v4021_v48 = vsel %vm748_vm11, %v830_v25, %v3878_v39  ;;  %v726_v29 = vxor.u32 2147483648, %v3906_v10 }
 0x2b3   :  { %vm4026_vm9 = vcmp.le.f32.partialorder %v850_v61, 0.7853982  ;;  %vm2088_vm13 = vcmp.gt.s32.totalorder %v2087_v63, 0  ;;  %2607 = vcosq.f32 %v4002_v27  ;;  %v1925_v17 = vadd.s32 %v3944_v26, %v3951_v14 }
 0x2b4   :  { %v1937_v55 = vclz %v2375_v12  ;;  %v2089_v13 = vsel %vm2088_vm13, %v2087_v63, 0  ;;  %v4036_v39 = vsel %vm4026_vm9, %v3690_v34, %v935_v53  ;;  %v1820_v25 = vmul.u32 %v1813_v46, %v1804_v57 }
 0x2b5   :  { %vm1822_vm0 = vc.u32 %v4008_v1, %v4011_v56  ;;  %v2091_v61 = vand.u32 31, %v2089_v13  ;;  %v1823_v58 = vadd.s32 1, %v4012_v40  ;;  %v4041_v16 = vshll.u32 %v2085_v37, 8 }
 0x2b6   :  { %v2376_v30 = vadd.s32 4294967294, %v1937_v55  ;;  %v4044_v21 = vmul.f32 30.0, %v3921_v36  ;;  %v4046_v26 = vshrl.u32 %v2089_v13, 5  ;;  %vm644_vm1 = vcmp.lt.s32.totalorder %v3664_v9, 0 }
 0x2b7   :  { %v2092_v14 = vsub.s32 32, %v2091_v61  ;;  %v2094_v18 = vshll.u32 %v4437_v49, %v2091_v61  ;;  %v2097_v52 = vshll.u32 %v4432_v8, %v2091_v61  ;;  %v1824_v19 = vsel %vm1822_vm0, %v1823_v58, %v4012_v40 }
 0x2b8   :  { %vm2377_vm5 = vcmp.lt.s32.totalorder %v2376_v30, 0  ;;  %v2100_v11 = vshll.u32 %v4433_v32, %v2091_v61  ;;  %v2103_v47 = vshll.u32 %v4441_v62, %v2091_v61  ;;  %v1825_v20 = vadd.s32 %v1824_v19, %v1820_v25 }
 0x2b9   :  { %v1940_v2 = vsel %vm2377_vm5, 0, %v2376_v30  ;;  %v2095_v46 = vshrl.u32 %v4432_v8, %v2092_v14  ;;  %v2106_v36 = vshll.u32 %v2692_v5, %v2091_v61  ;;  %v2098_v31 = vshrl.u32 %v4433_v32, %v2092_v14 }
 0x2ba   :  { %v1941_v60 = vsub.s32 32, %v1940_v2  ;;  %v1942_v42 = vshll.u32 %v3992_v15, %v1940_v2  ;;  %v1945_v57 = vsub.s32 4294967266, %v1940_v2  ;;  %v1826_v53 = vadd.s32 536870912, %v1825_v20 }
 0x2bb   :  { %v2096_v28 = vor.u32 %v2095_v46, %v2094_v18  ;;  %v2101_v63 = vshrl.u32 %v4441_v62, %v2092_v14  ;;  %v2104_v12 = vshrl.u32 %v2692_v5, %v2092_v14  ;;  %v2099_v55 = vor.u32 %v2098_v31, %v2097_v52 }
 0x2bc   :  { %v1943_v40 = vshrl.u32 %v1925_v17, %v1941_v60  ;;  %v1946_v37 = vadd.s32 127, %v1945_v57  ;;  %v2107_v13 = vshrl.u32 %v4434_v3, %v2092_v14  ;;  %v4060_v25 = vshrl.u32 %v1826_v53, 30 }
 0x2bd   :  { %v2102_v61 = vor.u32 %v2101_v63, %v2100_v11  ;;  %v2105_v30 = vor.u32 %v2104_v12, %v2103_v47  ;;  %v1973_v15 = vand.u32 2147483647, %v4044_v21  ;;  %v4063_v58 = vpop.eup %2607  ;;  %v2093_v2 = vshrl.u32 %v4437_v49, %v2092_v14  ;;  %v4298_v14 = vld [vmem:[%s4373_s4 + $0x8] sm:$0xff]  ;;  %s2694_s4 = smov [#allocation4]  }
 0x2be   :  { %v1944_v18 = vor.u32 %v1943_v40, %v1942_v42  ;;  %v1947_v19 = vshll.u32 %v1946_v37, 23  ;;  %v2108_v46 = vor.u32 %v2107_v13, %v2106_v36  ;;  %v1828_v17 = vshll.u32 %v4060_v25, 30  ;;  %s2297_s13 = sshll.u32 %s2694_s4, 4  ;;  %s2298_s13 = int_to_ptr.vmem [resolvable:$true] %s2297_s13 }
 0x2bf   :  { %vm2109_vm12 = vcmp.lt.s32.totalorder %v4046_v26, 1  ;;  %vm2110_vm3 = vcmp.lt.s32.totalorder %v4046_v26, 2  ;;  %vm2112_vm4 = vcmp.lt.s32.totalorder %v4046_v26, 4  ;;  %vm2111_vm8 = vcmp.lt.s32.totalorder %v4046_v26, 3  ;;  %s2639_s14 = scalar_lea.vmem %s2298_s13, 256  ;;  %p2644_p1 = scmp.lt.s32.totalorder %s2298_s13, %s2298_s13 }
 0x2c0   :  { %v1948_v52 = vor.u32 4788187, %v1947_v19  ;;  %v2114_v11 = vsel %vm2112_vm4, %v2102_v61, 2102212464  ;;  %v2117_v47 = vsel %vm2109_vm12, %v2096_v28, %v2099_v55  ;;  %v4072_v60 = vsub.s32 %v1825_v20, %v1828_v17  ;;  %p2640_p0 = scmp.ne.s32.totalorder %s2298_s13, %s2639_s14  ;;  %p2645_p2 = scmp.lt.s32.totalorder %s2639_s14, %s2639_s14 }
 0x2c1   :  { %v2113_v42 = vsel %vm2109_vm12, %v2093_v2, %v2096_v28  ;;  %v2118_v57 = vsel %vm2112_vm4, %v2105_v30, 920167782  ;;  %v2121_v31 = vsel %vm2109_vm12, %v2099_v55, %v2102_v61  ;;  %vm4076_vm2 = vcmp.le.f32.partialorder %v1869_v45, 0.7853982 }
 0x2c2   :  { %v1949_v36 = vand.u32 2147483647, %v1948_v52  ;;  %v1951_v53 = vcvt.s32.f32 %v1944_v18  ;;  %v2119_v63 = vsel %vm2111_vm8, %v2102_v61, %v2118_v57  ;;  %v2122_v12 = vsel %vm2112_vm4, %v2108_v46, 1326507024  ;;  %p2646_p3 = por %p2645_p2, %p2644_p1 }
 0x2c3   :  { %v1831_v40 = vsub.s32 0, %v4072_v60  ;;  %v2115_v37 = vsel %vm2111_vm8, %v2099_v55, %v2114_v11  ;;  %v2120_v20 = vsel %vm2110_vm3, %v2117_v47, %v2119_v63  ;;  %v2123_v13 = vsel %vm2111_vm8, %v2105_v30, %v2122_v12 }
 0x2c4   :  { %v1952_v28 = vmul.f32 %v1951_v53, %v1949_v36  ;;  %v2124_v19 = vsel %vm2110_vm3, %v2121_v31, %v2123_v13  ;;  %v4086_v45 = vmul.u32.u64.low %v4041_v16, %v2120_v20  ;;  %v4087_v2 = vmul.u32.u64.high %v4041_v16, %v2120_v20, %v4086_v45  ;;  %p2647_p4 = pnand %p2646_p3, %p2640_p0 }
 0x2c5   :  { %2609 = vsinq.f32 %v4002_v27  ;;  %v2371_v61 = vmin.u32 %v1831_v40, %v4072_v60  ;;  %v4092_v18 = vmul.u32.u64.low %v4041_v16, %v2124_v19  ;;  %v4093_v46 = vmul.u32.u64.high %v4041_v16, %v2124_v19, %v4092_v18 }
 0x2c6   :  { %v1953_v55 = vxor.u32 2147483648, %v1952_v28  ;;  %v2116_v30 = vsel %vm2110_vm3, %v2113_v42, %v2115_v37  ;;  %v1976_v17 = vand.u32 2139095040, %v4044_v21  ;;  %v728_v52 = vsub.s32 4, %v3796_v35 }
 0x2c7   :  { %v727_v27 = vsel %vm644_vm1, %v726_v29, %v3906_v10  ;;  %2611 = vcosq.f32 %v4036_v39  ;;  %vm1871_vm6 = vcmp.lt.s32.totalorder %v3832_v51, 0  ;;  %v1833_v11 = vclz %v2371_v61 }
 0x2c8   :  { %v1954_v47 = vsel %vm1871_vm6, %v1953_v55, %v1952_v28  ;;  %v2135_v26 = vadd.s32 1, %v4087_v2  ;;  %v1977_v42 = vshrl.u32 %v1976_v17, 23  ;;  %v1980_v57 = vand.u32 8388607, %v1973_v15 }
 0x2c9   :  { %2613 = vsinq.f32 %v4036_v39  ;;  %v2372_v31 = vadd.s32 4294967294, %v1833_v11  ;;  %v2132_v36 = vmul.u32 %v4041_v16, %v2116_v30  ;;  %vm2134_vm13 = vc.u32 %v4093_v46, %v4086_v45 }
 0x2ca   :  { %v2136_v10 = vsel %vm2134_vm13, %v2135_v26, %v4087_v2  ;;  %v2378_v29 = vadd.s32 4294967169, %v1977_v42  ;;  %vm4117_vm0 = vcmp.le.f32.partialorder %v642_v4, 0.7853982  ;;  %v729_v63 = vsel %vm644_vm1, %v728_v52, %v3796_v35 }
 0x2cb   :  { %v1957_v39 = vsel %vm4076_vm2, %v3832_v51, %v1954_v47  ;;  %v1821_v16 = vadd.s32 %v4011_v56, %v4008_v1  ;;  %vm2373_vm5 = vcmp.lt.s32.totalorder %v2372_v31, 0  ;;  %v2137_v12 = vadd.s32 %v2136_v10, %v2132_v36 }
 0x2cc   :  { %v1836_v40 = vsel %vm2373_vm5, 0, %v2372_v31  ;;  %v1981_v37 = vor.u32 8388608, %v1980_v57  ;;  %v1983_v20 = vadd.s32 1, %v2378_v29  ;;  %v730_v4 = vsel %vm4117_vm0, %v3664_v9, %v727_v27 }
 0x2cd   :  { %v1837_v13 = vsub.s32 32, %v1836_v40  ;;  %v1841_v28 = vsub.s32 4294967266, %v1836_v40  ;;  %v2138_v19 = vadd.s32 536870912, %v2137_v12  ;;  %v731_v35 = vsel %vm4117_vm0, 0, %v729_v63 }
 0x2ce   :  { %2615 = vcosq.f32 %v1957_v39  ;;  %v1838_v2 = vshll.u32 %v4072_v60, %v1836_v40  ;;  %v4136_v1 = vadd.s32 %v4086_v45, %v4093_v46  ;;  %vm1984_vm1 = vcmp.gt.s32.totalorder %v1983_v20, 0 }
 0x2cf   :  { %v4138_v56 = vpop.eup %2609  ;;  %v1839_v61 = vshrl.u32 %v1821_v16, %v1837_v13  ;;  %v1842_v18 = vadd.s32 127, %v1841_v28  ;;  %v4140_v55 = vshrl.u32 %v2138_v19, 30  ;;  %v1985_v30 = vsel %vm1984_vm1, %v1983_v20, 0 }
 0x2d0   :  { %v1987_v17 = vand.u32 31, %v1985_v30  ;;  %v4142_v52 = vshll.u32 %v1981_v37, 8  ;;  %2617 = vsinq.f32 %v730_v4  ;;  %v735_v27 = vadd.s32 3, %v731_v35 }
 0x2d1   :  { %v4144_v11 = vpop.eup %2611  ;;  %v1840_v47 = vor.u32 %v1839_v61, %v1838_v2  ;;  %v1843_v60 = vshll.u32 %v1842_v18, 23  ;;  %v2140_v45 = vshll.u32 %v4140_v55, 30  ;;  %2619 = vcosq.f32 %v730_v4 }
 0x2d2   :  { %v4147_v46 = vshrl.u32 %v1985_v30, 5  ;;  %v1988_v26 = vsub.s32 32, %v1987_v17  ;;  %v1990_v42 = vshll.u32 %v4437_v49, %v1987_v17  ;;  %v832_v57 = vsub.s32 4, %v3768_v24 }
 0x2d3   :  { %v4151_v31 = vpop.eup %2613  ;;  %v1844_v36 = vor.u32 4788187, %v1843_v60  ;;  %v4153_v10 = vsub.s32 %v2137_v12, %v2140_v45  ;;  %v1993_v29 = vshll.u32 %v4432_v8, %v1987_v17  ;;  %v1996_v53 = vshll.u32 %v4433_v32, %v1987_v17 }
 0x2d4   :  { %v1847_v63 = vcvt.s32.f32 %v1840_v47  ;;  %v1991_v16 = vshrl.u32 %v4432_v8, %v1988_v26  ;;  %v1994_v40 = vshrl.u32 %v4433_v32, %v1988_v26  ;;  %v1997_v37 = vshrl.u32 %v4441_v62, %v1988_v26 }
 0x2d5   :  { %v1845_v20 = vand.u32 2147483647, %v1844_v36  ;;  %v2143_v4 = vsub.s32 0, %v4153_v10  ;;  %v1999_v13 = vshll.u32 %v4441_v62, %v1987_v17  ;;  %v2000_v28 = vshrl.u32 %v2692_v5, %v1988_v26 }
 0x2d6   :  { %vm1767_vm12 = vcmp.lt.s32.totalorder %v3841_v41, 0  ;;  %v1992_v12 = vor.u32 %v1991_v16, %v1990_v42  ;;  %v1995_v19 = vor.u32 %v1994_v40, %v1993_v29  ;;  %v2002_v35 = vshll.u32 %v2692_v5, %v1987_v17 }
 0x2d7   :  { %v2003_v2 = vshrl.u32 %v4434_v3, %v1988_v26  ;;  %v1848_v8 = vmul.f32 %v1847_v63, %v1845_v20  ;;  %v2383_v32 = vmin.u32 %v2143_v4, %v4153_v10  ;;  %v1998_v61 = vor.u32 %v1997_v37, %v1996_v53 }
 0x2d8   :  { %v2001_v18 = vor.u32 %v2000_v28, %v1999_v13  ;;  %v4167_v30 = vpop.eup %2615  ;;  %2621 = vsinq.f32 %v1957_v39  ;;  %v736_v62 = vand.u32 3, %v735_v27  ;;  %vm4171_vm3 = vcmp.le.f32.partialorder %v746_v23, 0.7853982 }
 0x2d9   :  { %v2004_v47 = vor.u32 %v2003_v2, %v2002_v35  ;;  %v833_v5 = vsel %vm748_vm11, %v832_v57, %v3768_v24  ;;  %v2145_v3 = vclz %v2383_v32  ;;  %v1989_v17 = vshrl.u32 %v4437_v49, %v1988_v26 }
 0x2da   :  { %vm2005_vm4 = vcmp.lt.s32.totalorder %v4147_v46, 1  ;;  %vm2008_vm8 = vcmp.lt.s32.totalorder %v4147_v46, 4  ;;  %v2618_v39 = vpop.eup %2617  ;;  %vm4183_vm13 = vcmp.le.f32.partialorder %v1765_v50, 0.7853982  ;;  %v1849_v23 = vxor.u32 2147483648, %v1848_v8 }
 0x2db   :  { %vm2007_vm0 = vcmp.lt.s32.totalorder %v4147_v46, 3  ;;  %v2013_v45 = vsel %vm2005_vm4, %v1992_v12, %v1995_v19  ;;  %v2014_v42 = vsel %vm2008_vm8, %v2001_v18, 920167782  ;;  %v2620_v24 = vpop.eup %2619  ;;  %v2384_v57 = vadd.s32 4294967294, %v2145_v3 }
 0x2dc   :  { %v2010_v36 = vsel %vm2008_vm8, %v1998_v61, 2102212464  ;;  %v2015_v49 = vsel %vm2007_vm0, %v1998_v61, %v2014_v42  ;;  %v2017_v26 = vsel %vm2005_vm4, %v1995_v19, %v1998_v61  ;;  %vm2006_vm11 = vcmp.lt.s32.totalorder %v4147_v46, 2 }
 0x2dd   :  { %v2009_v29 = vsel %vm2005_vm4, %v1989_v17, %v1992_v12  ;;  %v2018_v53 = vsel %vm2008_vm8, %v2004_v47, 1326507024  ;;  %vm738_vm5 = vcmp.eq.s32.totalorder %v736_v62, 0  ;;  %vm2385_vm1 = vcmp.lt.s32.totalorder %v2384_v57, 0 }
 0x2de   :  { %v2016_v50 = vsel %vm2006_vm11, %v2013_v45, %v2015_v49  ;;  %v2019_v63 = vsel %vm2007_vm0, %v2001_v18, %v2018_v53  ;;  %v739_v16 = vxor.u32 2147483648, %v2618_v39  ;;  %v2148_v40 = vsel %vm2385_vm1, 0, %v2384_v57 }
 0x2df   :  { %v2011_v37 = vsel %vm2007_vm0, %v1995_v19, %v2010_v36  ;;  %v2020_v20 = vsel %vm2006_vm11, %v2017_v26, %v2019_v63  ;;  %v742_v4 = vxor.u32 2147483648, %v2620_v24  ;;  %v1850_v13 = vsel %vm1767_vm12, %v1849_v23, %v1848_v8 }
 0x2e0   :  { %v2149_v28 = vsub.s32 32, %v2148_v40  ;;  %v2153_v12 = vsub.s32 4294967266, %v2148_v40  ;;  %vm741_vm4 = vcmp.eq.s32.totalorder %v736_v62, 2  ;;  %v2012_v19 = vsel %vm2006_vm11, %v2009_v29, %v2011_v37 }
 0x2e1   :  { %v4202_v35 = vmul.u32.u64.low %v4142_v52, %v2020_v20  ;;  %v4203_v2 = vmul.u32.u64.high %v4142_v52, %v2020_v20, %v4202_v35  ;;  %v4206_v32 = vmul.u32.u64.low %v4142_v52, %v2016_v50  ;;  %v4207_v61 = vmul.u32.u64.high %v4142_v52, %v2016_v50, %v4206_v32 }
 0x2e2   :  { %v2154_v18 = vadd.s32 127, %v2153_v12  ;;  %v740_v47 = vsel %vm738_vm5, %v2620_v24, %v739_v16  ;;  %v834_v8 = vsel %vm4171_vm3, %v3662_v38, %v4021_v48  ;;  %v4216_v3 = vpop.eup %2621  ;;  %v2151_v17 = vshrl.u32 %v4136_v1, %v2149_v28 }
 0x2e3   :  { %v743_v23 = vsel %vm741_vm4, %v742_v4, %v2618_v39  ;;  %v835_v45 = vsel %vm4171_vm3, 0, %v833_v5  ;;  %2623 = vcosq.f32 %v834_v8  ;;  %v1853_v46 = vsel %vm4183_vm13, %v3841_v41, %v1850_v13 }
 0x2e4   :  { %v2155_v42 = vshll.u32 %v2154_v18, 23  ;;  %vm737_vm8 = vcmp.lt.s32.totalorder %v736_v62, 2  ;;  %2625 = vsinq.f32 %v834_v8  ;;  %v2150_v24 = vshll.u32 %v4153_v10, %v2148_v40 }
 0x2e5   :  { %vm2030_vm0 = vc.u32 %v4203_v2, %v4206_v32  ;;  %v2031_v48 = vadd.s32 1, %v4207_v61  ;;  %v839_v57 = vadd.s32 3, %v835_v45  ;;  %v2028_v39 = vmul.u32 %v4142_v52, %v2012_v19 }
 0x2e6   :  { %v2156_v1 = vor.u32 4788187, %v2155_v42  ;;  %v744_v60 = vsel %vm737_vm8, %v740_v47, %v743_v23  ;;  %v936_v5 = vsub.s32 4, %v3911_v59  ;;  %2627 = vcosq.f32 %v1853_v46 }
 0x2e7   :  { %v2152_v36 = vor.u32 %v2151_v17, %v2150_v24  ;;  %v2032_v49 = vsel %vm2030_vm0, %v2031_v48, %v4207_v61  ;;  %vm734_vm3 = vweird.f32 %v3664_v9  ;;  %v840_v26 = vand.u32 3, %v839_v57 }
 0x2e8   :  { %v2033_v62 = vadd.s32 %v2032_v49, %v2028_v39  ;;  %v937_v10 = vsel %vm852_vm7, %v936_v5, %v3911_v59  ;;  %v1040_v29 = vsub.s32 4, %v3839_v0  ;;  %2629 = vsinq.f32 %v1853_v46 }
 0x2e9   :  { %v2157_v53 = vand.u32 2147483647, %v2156_v1  ;;  %v745_v52 = vsel %vm734_vm3, nan, %v744_v60  ;;  %v939_v50 = vsel %vm4026_vm9, 0, %v937_v10  ;;  %v4238_v63 = vadd.s32 %v4206_v32, %v4203_v2 }
 0x2ea   :  { %v2034_v16 = vadd.s32 536870912, %v2033_v62  ;;  %vm838_vm11 = vweird.f32 %v3662_v38  ;;  %v943_v9 = vadd.s32 3, %v939_v50  ;;  %v1041_v40 = vsel %vm956_vm10, %v1040_v29, %v3839_v0 }
 0x2eb   :  { %v2159_v59 = vcvt.s32.f32 %v2152_v36  ;;  %vm942_vm7 = vweird.f32 %v3690_v34  ;;  %v947_v37 = vxor.u32 2147483648, %v4151_v31  ;;  %v1043_v43 = vsel %vm3976_vm14, 0, %v1041_v40 }
 0x2ec   :  { %v4248_v20 = vshrl.u32 %v2034_v16, 30  ;;  %vm841_vm9 = vcmp.lt.s32.totalorder %v840_v26, 2  ;;  %v944_v4 = vand.u32 3, %v943_v9  ;;  %v950_v13 = vxor.u32 2147483648, %v4144_v11 }
 0x2ed   :  { %v2624_v28 = vpop.eup %2623  ;;  %v2160_v12 = vmul.f32 %v2159_v59, %v2157_v53  ;;  %vm842_vm5 = vcmp.eq.s32.totalorder %v840_v26, 0  ;;  %vm845_vm1 = vcmp.eq.s32.totalorder %v840_v26, 2  ;;  %v1047_v35 = vadd.s32 3, %v1043_v43 }
 0x2ee   :  { %v2626_v0 = vpop.eup %2625  ;;  %v2036_v2 = vshll.u32 %v4248_v20, 30  ;;  %v846_v32 = vxor.u32 2147483648, %v2624_v28  ;;  %vm1046_vm10 = vweird.f32 %v3672_v22  ;;  %v1851_v54 = vsub.s32 4, %v4060_v25 }
 0x2ef   :  { %v843_v61 = vxor.u32 2147483648, %v2626_v0  ;;  %vm946_vm14 = vcmp.eq.s32.totalorder %v944_v4, 0  ;;  %v1051_v18 = vxor.u32 2147483648, %v4138_v56  ;;  %v1054_v19 = vxor.u32 2147483648, %v4063_v58 }
 0x2f0   :  { %vm2079_vm4 = vcmp.lt.s32.totalorder %v3917_v7, 0  ;;  %v4257_v47 = vsub.s32 %v2033_v62, %v2036_v2  ;;  %v847_v8 = vsel %vm845_vm1, %v846_v32, %v2626_v0  ;;  %v948_v17 = vsel %vm946_vm14, %v4144_v11, %v947_v37  ;;  %v2628_v23 = vpop.eup %2627 }
 0x2f1   :  { %vm949_vm8 = vcmp.eq.s32.totalorder %v944_v4, 2  ;;  %v844_v45 = vsel %vm842_vm5, %v2624_v28, %v843_v61  ;;  %vm945_vm0 = vcmp.lt.s32.totalorder %v944_v4, 2  ;;  %v1048_v42 = vand.u32 3, %v1047_v35 }
 0x2f2   :  { %v951_v46 = vsel %vm949_vm8, %v950_v13, %v4151_v31  ;;  %v2039_v24 = vsub.s32 0, %v4257_v47  ;;  %v848_v48 = vsel %vm841_vm9, %v844_v45, %v847_v8  ;;  %v1852_v1 = vsel %vm1767_vm12, %v1851_v54, %v4060_v25  ;;  %v2630_v39 = vpop.eup %2629 }
 0x2f3   :  { %v952_v57 = vsel %vm945_vm0, %v948_v17, %v951_v46  ;;  %v2161_v60 = vxor.u32 2147483648, %v2160_v12  ;;  %v849_v11 = vsel %vm838_vm11, nan, %v848_v48  ;;  %vm1050_vm3 = vcmp.eq.s32.totalorder %v1048_v42, 0 }
 0x2f4   :  { %v953_v5 = vsel %vm942_vm7, nan, %v952_v57  ;;  %v2379_v31 = vmin.u32 %v2039_v24, %v4257_v47  ;;  %v2474_v36 = vpack.c.bf16 %v849_v11, %v745_v52  ;;  %v1052_v49 = vsel %vm1050_vm3, %v4063_v58, %v1051_v18 }
 0x2f5   :  { %vm1053_vm9 = vcmp.eq.s32.totalorder %v1048_v42, 2  ;;  %vm1049_vm5 = vcmp.lt.s32.totalorder %v1048_v42, 2  ;;  %v1854_v25 = vsel %vm4183_vm13, 0, %v1852_v1  ;;  %v1955_v26 = vsub.s32 4, %v3988_v6 }
 0x2f6   :  { %v1055_v62 = vsel %vm1053_vm9, %v1054_v19, %v4138_v56  ;;  %vm4279_vm12 = vcmp.le.f32.partialorder %v2077_v44, 0.7853982  ;;  %v2041_v34 = vclz %v2379_v31  ;;  %2475 = vmatprep.subr.bf16.mxu1 %v2474_v36  ;;  %vm1857_vm11 = vweird.f32 %v3841_v41 }
 0x2f7   :  { %v1056_v10 = vsel %vm1049_vm5, %v1052_v49, %v1055_v62  ;;  %v1858_v58 = vadd.s32 3, %v1854_v25  ;;  %2477 = vmatpush3.bf16.msra.mxu1 %v2474_v36  ;;  %v1862_v27 = vxor.u32 2147483648, %v2630_v39  ;;  %v1865_v29 = vxor.u32 2147483648, %v2628_v23 }
 0x2f8   :  { %v1057_v56 = vsel %vm1046_vm10, nan, %v1056_v10  ;;  %v1956_v53 = vsel %vm1871_vm6, %v1955_v26, %v3988_v6  ;;  %v2380_v44 = vadd.s32 4294967294, %v2041_v34  ;;  %v2162_v9 = vsel %vm2079_vm4, %v2161_v60, %v2160_v12 }
 0x2f9   :  { %v2478_v52 = vpack.c.bf16 %v1057_v56, %v953_v5  ;;  %v1859_v50 = vand.u32 3, %v1858_v58  ;;  %v1958_v16 = vsel %vm4076_vm2, 0, %v1956_v53  ;;  %v1966_v59 = vxor.u32 2147483648, %v4216_v3 }
 0x2fa   :  { %v1962_v40 = vadd.s32 3, %v1958_v16  ;;  %v1969_v22 = vxor.u32 2147483648, %v4167_v30  ;;  %vm2381_vm13 = vcmp.lt.s32.totalorder %v2380_v44, 0  ;;  %v2165_v18 = vsel %vm4279_vm12, %v3917_v7, %v2162_v9 }
 0x2fb   :  { %2479 = vmatprep.subr.bf16.mxu1 %v2478_v52  ;;  %vm1860_vm7 = vcmp.lt.s32.totalorder %v1859_v50, 2  ;;  %vm1861_vm1 = vcmp.eq.s32.totalorder %v1859_v50, 0  ;;  %vm1864_vm10 = vcmp.eq.s32.totalorder %v1859_v50, 2  ;;  %v2044_v6 = vsel %vm2381_vm13, 0, %v2380_v44  ;;  %v1070_v44 = vpop.permute.xlu1 %1069 }
 0x2fc   :  { %2481 = vmatpush3.bf16.msra.mxu1 %v2478_v52  ;;  %v1863_v37 = vsel %vm1861_vm1, %v2628_v23, %v1862_v27  ;;  %v1866_v43 = vsel %vm1864_vm10, %v1865_v29, %v2630_v39  ;;  %v1963_v4 = vand.u32 3, %v1962_v40  ;;  %v2045_v13 = vsub.s32 32, %v2044_v6  ;;  %v4498_v52 = vld [vmem:[#allocation8_spill] sm:$0xff] }
 0x2fd   :  { %v2046_v28 = vshll.u32 %v4257_v47, %v2044_v6  ;;  %v2049_v12 = vsub.s32 4294967266, %v2044_v6  ;;  %v1867_v35 = vsel %vm1860_vm7, %v1863_v37, %v1866_v43  ;;  %vm1961_vm8 = vweird.f32 %v3832_v51 }
 0x2fe   :  { %v1868_v0 = vsel %vm1857_vm11, nan, %v1867_v35  ;;  %vm1964_vm2 = vcmp.lt.s32.totalorder %v1963_v4, 2  ;;  %vm1965_vm6 = vcmp.eq.s32.totalorder %v1963_v4, 0  ;;  %vm1968_vm14 = vcmp.eq.s32.totalorder %v1963_v4, 2 }
 0x2ff   :  { %v2047_v2 = vshrl.u32 %v4238_v63, %v2045_v13  ;;  %v2050_v32 = vadd.s32 127, %v2049_v12  ;;  %2439 = vmatmul.mubr.msk.f32.vlgmr.msra.gmra.mrb[0].mxu1 %vm540_vm15, %v4298_v14  ;;  %v1967_v54 = vsel %vm1965_vm6, %v4167_v30, %v1966_v59  ;;  %v1970_v61 = vsel %vm1968_vm14, %v1969_v22, %v4216_v3 }
 0x300   :  { %v1971_v41 = vsel %vm1964_vm2, %v1967_v54, %v1970_v61  ;;  %2463 = vmatprep.mubr.msk.f32.mxu1 %vm540_vm15, %v3895_v33  ;;  %v2163_v17 = vsub.s32 4, %v4140_v55  ;;  %2631 = vcosq.f32 %v2165_v18  ;;  %v2059_v33 = vsub.s32 4, %v4248_v20 }
 0x301   :  { %v2048_v19 = vor.u32 %v2047_v2, %v2046_v28  ;;  %v2051_v63 = vshll.u32 %v2050_v32, 23  ;;  %v1972_v47 = vsel %vm1961_vm8, nan, %v1971_v41  ;;  %2633 = vsinq.f32 %v2165_v18 }
 0x302   :  { %v2490_v8 = vpack.c.bf16 %v1972_v47, %v1868_v0  ;;  %v2164_v51 = vsel %vm2079_vm4, %v2163_v17, %v4140_v55  ;;  %vm1975_vm0 = vcmp.lt.s32.totalorder %v4044_v21, 0  ;;  %vm1974_vm3 = vcmp.le.f32.partialorder %v1973_v15, 0.7853982 }
 0x303   :  { %v2052_v30 = vor.u32 4788187, %v2051_v63  ;;  %v2055_v23 = vcvt.s32.f32 %v2048_v19  ;;  %v2166_v42 = vsel %vm4279_vm12, 0, %v2164_v51  ;;  %v2060_v48 = vsel %vm1975_vm0, %v2059_v33, %v4248_v20 }
 0x304   :  { %2491 = vmatprep.subr.bf16.mxu1 %v2490_v8  ;;  %v2170_v1 = vadd.s32 3, %v2166_v42  ;;  %v2062_v60 = vsel %vm1974_vm3, 0, %v2060_v48  ;;  %vm2169_vm13 = vweird.f32 %v3917_v7  ;;  %vm2065_vm1 = vweird.f32 %v4044_v21  ;;  %v1065_v7 = vpop.permute.xlu0 %1064 }
 0x305   :  { %v2053_v3 = vand.u32 2147483647, %v2052_v30  ;;  %2493 = vmatpush3.bf16.msra.mxu1 %v2490_v8  ;;  %v2066_v5 = vadd.s32 3, %v2062_v60  ;;  %vm32_vm10 = vcmp.lt.s32.totalorder %v4498_v52, 16 }
 0x306   :  { %v2171_v11 = vand.u32 3, %v2170_v1 }
 0x307   :  { %v2056_v45 = vmul.f32 %v2055_v23, %v2053_v3  ;;  %v2067_v49 = vand.u32 3, %v2066_v5 }
 0x308   :  { %vm2173_vm4 = vcmp.eq.s32.totalorder %v2171_v11, 0  ;;  %vm2176_vm9 = vcmp.eq.s32.totalorder %v2171_v11, 2  ;;  %vm2172_vm5 = vcmp.lt.s32.totalorder %v2171_v11, 2 }
 0x309   :  { %v2057_v46 = vxor.u32 2147483648, %v2056_v45  ;;  %vm2072_vm12 = vcmp.eq.s32.totalorder %v2067_v49, 2  ;;  %vm2069_vm11 = vcmp.eq.s32.totalorder %v2067_v49, 0  ;;  %vm2068_vm7 = vcmp.lt.s32.totalorder %v2067_v49, 2 }
 0x30a   :  { %v2632_v39 = vpop.eup %2631 }
 0x30b   :  { %v2058_v24 = vsel %vm1975_vm0, %v2057_v46, %v2056_v45  ;;  %v2634_v55 = vpop.eup %2633  ;;  %v2177_v36 = vxor.u32 2147483648, %v2632_v39 }
 0x30c   :  { %v2061_v57 = vsel %vm1974_vm3, %v4044_v21, %v2058_v24  ;;  %v2174_v31 = vxor.u32 2147483648, %v2634_v55 }
 0x30d   :  { %2635 = vcosq.f32 %v2061_v57  ;;  %v2178_v15 = vsel %vm2176_vm9, %v2177_v36, %v2634_v55 }
 0x30e   :  { %2637 = vsinq.f32 %v2061_v57  ;;  %v2175_v62 = vsel %vm2173_vm4, %v2632_v39, %v2174_v31 }
 0x30f   :  { %v2179_v38 = vsel %vm2172_vm5, %v2175_v62, %v2178_v15 }
 0x310   :  { %v2180_v56 = vsel %vm2169_vm13, nan, %v2179_v38 }
 0x317   :  { %v2636_v25 = vpop.eup %2635 }
 0x318   :  { %v2638_v20 = vpop.eup %2637  ;;  %v2073_v26 = vxor.u32 2147483648, %v2636_v25 }
 0x319   :  { %v2070_v34 = vxor.u32 2147483648, %v2638_v20 }
 0x31a   :  { %v2074_v10 = vsel %vm2072_vm12, %v2073_v26, %v2638_v20 }
 0x31b   :  { %v2071_v58 = vsel %vm2069_vm11, %v2636_v25, %v2070_v34 }
 0x31c   :  { %v2075_v27 = vsel %vm2068_vm7, %v2071_v58, %v2074_v10 }
 0x31d   :  { %v2076_v29 = vsel %vm2065_vm1, nan, %v2075_v27 }
 0x31e   :  { %v2494_v53 = vpack.c.bf16 %v2180_v56, %v2076_v29 }
 0x320   :  { %2495 = vmatprep.subr.bf16.mxu1 %v2494_v53 }
 0x321   :  { %2497 = vmatpush3.bf16.msra.mxu1 %v2494_v53 }
 0x324   :  { %2464 = vmatmul.mubr.msk.f32.vlgmr.msra.gmra.mrb[2].mxu1 %vm540_vm15, %v4298_v14 }
 0x3d2   :  { %v2440_v50 = vpop.f32.mrb[0].mxu1 }
 0x3d3   :  { %v1150_v16 = vadd.f32 %v2440_v50, %v1070_v44  ;;  %v1144_v9 = vpop.f32.mrb[1].mxu1 }
 0x3d4   :  { %v1145_v40 = vadd.f32 %v1144_v9, %v1065_v7 }
 0x3d5   :  { %v1156_v21 = vsel %vm32_vm10, %v1150_v16, 0.0 }
 0x3d6   :  { %1158 = vst [vmem:[#allocation4 + $0x8] sm:$0xff] %v1156_v21  ;;  %v1155_v59 = vsel %vm32_vm10, %v1145_v40, 0.0 }
 0x3d7   :  { %1157 = vst [vmem:[#allocation4] sm:$0xff] %v1155_v59 }
 0x3d8   :  { %2650 = shalt.err (!%p2647_p4)
}
 0x3d9   :  { %s2651_s0 = scalar_lea.hbm %s4376_s7, 256 }
 0x3da   :  { %p2652_p5 = scmp.ne.s32.totalorder %s4376_s7, %s2651_s0  ;;  %p2655_p6 = scmp.lt.u32.totalorder %s2651_s0, %s4376_s7 }
 0x3dc   :  { %p2657_p7 = pnand %p2655_p6, %p2652_p5 }
 0x3de   :  { %2660 = shalt.err (!%p2657_p7)
}
 0x3df   :  { %s2695_s20 = smov 128   ;;  %s2696_s21 = smov 8   ;;  %v2193_v22 = vpop.permute.xlu1 %2192  ;;  %v2188_v14 = vpop.permute.xlu0 %2187 }
 0x3e0   :  { %2303 = dma.vmem_to_hbm [thread:$0]  %s2298_s13, 256, %s4376_s7, [#allocation5], %s2695_s20, %s2695_s20, %s2696_s21  }
 0x3e1   :  { %s2697_s24 = smov [#allocation2]  }
 0x3e2   :  { %s2285_s25 = sshll.u32 %s2697_s24, 4  ;;  %s2286_s25 = int_to_ptr.vmem [resolvable:$true] %s2285_s25 }
 0x3e3   :  { %s2661_s26 = scalar_lea.vmem %s2286_s25, 256  ;;  %p2666_p9 = scmp.lt.s32.totalorder %s2286_s25, %s2286_s25 }
 0x3e4   :  { %p2662_p8 = scmp.ne.s32.totalorder %s2286_s25, %s2661_s26  ;;  %p2667_p10 = scmp.lt.s32.totalorder %s2661_s26, %s2661_s26 }
 0x3e6   :  { %p2668_p11 = por %p2667_p10, %p2666_p9 }
 0x3e8   :  { %p2669_p12 = pnand %p2668_p11, %p2662_p8 }
 0x3f7   :  { %v2465_v6 = vpop.f32.mrb[2].mxu1 }
 0x3f8   :  { %v2273_v37 = vadd.f32 %v2465_v6, %v2193_v22  ;;  %v2267_v43 = vpop.f32.mrb[3].mxu1 }
 0x3f9   :  { %v2268_v4 = vadd.f32 %v2267_v43, %v2188_v14 }
 0x3fa   :  { %v2277_v13 = vsel %vm32_vm10, %v2273_v37, 0.0 }
 0x3fb   :  { %2279 = vst [vmem:[#allocation2 + $0x8] sm:$0xff] %v2277_v13  ;;  %v2276_v28 = vsel %vm32_vm10, %v2268_v4, 0.0 }
 0x3fc   :  { %2278 = vst [vmem:[#allocation2] sm:$0xff] %v2276_v28 }
 0x3fd   :  { %2672 = shalt.err (!%p2669_p12)
}
 0x3fe   :  { %s2673_s5 = scalar_lea.hbm %s4375_s6, 256 }
 0x3ff   :  { %p2674_p13 = scmp.ne.s32.totalorder %s4375_s6, %s2673_s5  ;;  %p2677_p0 = scmp.lt.u32.totalorder %s2673_s5, %s4375_s6 }
 0x401   :  { %p2679_p1 = pnand %p2677_p0, %p2674_p13 }
 0x403   :  { %2682 = shalt.err (!%p2679_p1)
}
 0x404   :  { %2291 = dma.vmem_to_hbm [thread:$0]  %s2286_s25, 256, %s4375_s6, [#allocation3], %s2695_s20, %s2695_s20, %s2696_s21  }
 0x405   :  { %2683 = dma.done.wait [#allocation3], 256  }
 0x406   :  { %2684 = vsyncadd [#allocation3], 4294967040 }
 0x407   :  { %2685 = dma.done.wait [#allocation5], 256  }
 0x408   :  { %2686 = vsyncadd [#allocation5], 4294967040 }
 0x409   :  { %2310 = vsyncpa [#allocation3], 1 }
 0x40a   :  { %2311 = vsyncpa [#allocation5], 1 }

</bundles_post_ra>
